<compile_context>
chip_gen: v7x
topology: tpu7x:2x2x1
jax: 0.10.0
libtpu: 0.0.40
codegen_flags: <defaults>
</compile_context>

<pallas_src>
import jax
import jax.numpy as jnp
from jax.experimental import pallas as pl
from jax.experimental.pallas import tpu as pltpu


def _round_up(x, m):
    return ((x + m - 1) // m) * m


def _gru_kernel(x_ref, wih_ref, whh_ref, bgi_ref, bhn_ref, hout_ref, gi_scratch):
    """x_ref:   (T*Bp, Dp)   time-major, batch-padded, input-dim-padded inputs
       wih_ref: (Dp, 3*Hp)   W_ih^T with each gate [r|z|n] in its own Hp-wide block
       whh_ref: (Hp, 3*Hp)   W_hh^T, same per-gate layout
       bgi_ref: (1, 3*Hp)    folded bias for the hoisted input projection
       bhn_ref: (1, Hp)      b_hh_n (applied before the r * (.) multiply)
       hout_ref:(Bp, Hp)     final hidden state
       gi_scratch: (T*Bp, 3*Hp) VMEM scratch holding the hoisted projection."""
    Bp, Hp = hout_ref.shape
    T = x_ref.shape[0] // Bp

    # Hoisted input projection for ALL timesteps in one MXU matmul.
    gi_scratch[...] = (
        jnp.dot(x_ref[...], wih_ref[...], preferred_element_type=jnp.float32)
        + bgi_ref[...]
    )

    whh = whh_ref[...]          # resident weights, loaded once
    bhn = bhn_ref[...]          # (1, Hp)

    def step(t, h):
        off = pl.multiple_of(t * Bp, 8)                     # sublane-aligned slice
        gi = gi_scratch[pl.ds(off, Bp), :]                  # (Bp, 3Hp)
        gh = jnp.dot(h, whh, preferred_element_type=jnp.float32)  # (Bp, 3Hp)

        # Gate slices land on 128-lane tile boundaries (Hp is a multiple of 128).
        r = jax.nn.sigmoid(gi[:, 0:Hp] + gh[:, 0:Hp])
        z = jax.nn.sigmoid(gi[:, Hp:2 * Hp] + gh[:, Hp:2 * Hp])
        n = jnp.tanh(gi[:, 2 * Hp:3 * Hp] + r * (gh[:, 2 * Hp:3 * Hp] + bhn))
        return (1.0 - z) * n + z * h

    h0 = jnp.zeros((Bp, Hp), jnp.float32)
    h_final = jax.lax.fori_loop(0, T, step, h0, unroll=True)
    hout_ref[...] = h_final.astype(hout_ref.dtype)


def question_encoder_forward(x, w_ih, w_hh, b_ih, b_hh):
    """x: (B, T, in_dim); PyTorch-style GRU params:
       w_ih: (3H, in_dim), w_hh: (3H, H), b_ih/b_hh: (3H,) with gate order [r, z, n].
       Returns the final hidden state (B, H), matching QuestionEncoder.forward."""
    B, T, D = x.shape
    H = w_hh.shape[1]

    if T == 0:  # PyTorch h0 defaults to zeros; empty sequence returns h0.
        return jnp.zeros((B, H), jnp.float32)

    Bp = _round_up(max(B, 1), 8)      # sublane multiple
    Hp = _round_up(H, 128)            # lane multiple (per gate)
    Dp = _round_up(D, 128)            # lane multiple for the hoisted matmul

    # x: (B, T, D) -> time-major padded flat (T*Bp, Dp).
    x_tbd = jnp.transpose(x, (1, 0, 2)).astype(jnp.float32)
    x_pad = jnp.zeros((T, Bp, Dp), jnp.float32).at[:, :B, :D].set(x_tbd)
    x_flat = x_pad.reshape(T * Bp, Dp)

    # Per-gate lane-dense, transposed, padded weights and folded biases.
    wih_p = jnp.zeros((Dp, 3 * Hp), jnp.float32)
    whh_p = jnp.zeros((Hp, 3 * Hp), jnp.float32)
    bgi_p = jnp.zeros((1, 3 * Hp), jnp.float32)
    bhn_p = jnp.zeros((1, Hp), jnp.float32)
    for g in range(3):                              # gate order [r, z, n]
        wih_g = w_ih[g * H:(g + 1) * H, :].astype(jnp.float32)   # (H, D)
        whh_g = w_hh[g * H:(g + 1) * H, :].astype(jnp.float32)   # (H, H)
        wih_p = wih_p.at[:D, g * Hp:g * Hp + H].set(wih_g.T)
        whh_p = whh_p.at[:H, g * Hp:g * Hp + H].set(whh_g.T)
        bih_g = b_ih[g * H:(g + 1) * H].astype(jnp.float32)
        bhh_g = b_hh[g * H:(g + 1) * H].astype(jnp.float32)
        if g < 2:   # r, z: both biases fold into the hoisted input projection
            bgi_p = bgi_p.at[0, g * Hp:g * Hp + H].set(bih_g + bhh_g)
        else:       # n: only b_ih folds; b_hh_n is applied inside the loop
            bgi_p = bgi_p.at[0, g * Hp:g * Hp + H].set(bih_g)
            bhn_p = bhn_p.at[0, :H].set(bhh_g)

    out_p = pl.pallas_call(
        _gru_kernel,
        out_shape=jax.ShapeDtypeStruct((Bp, Hp), jnp.float32),
        in_specs=[pl.BlockSpec(memory_space=pltpu.MemorySpace.VMEM)] * 5,
        out_specs=pl.BlockSpec(memory_space=pltpu.MemorySpace.VMEM),
        scratch_shapes=[pltpu.VMEM((T * Bp, 3 * Hp), jnp.float32)],
    )(x_flat, wih_p, whh_p, bgi_p, bhn_p)

    return out_p[:B, :H]


def _gru_reference(x, w_ih, w_hh, b_ih, b_hh):
    """Pure-JAX reference for the GRU final hidden state (PyTorch semantics)."""
    B, T, D = x.shape
    H = w_hh.shape[1]

    def step(h, x_t):
        gi = x_t @ w_ih.T + b_ih
        gh = h @ w_hh.T + b_hh
        i_r, i_z, i_n = gi[:, :H], gi[:, H:2 * H], gi[:, 2 * H:]
        h_r, h_z, h_n = gh[:, :H], gh[:, H:2 * H], gh[:, 2 * H:]
        r = jax.nn.sigmoid(i_r + h_r)
        z = jax.nn.sigmoid(i_z + h_z)
        n = jnp.tanh(i_n + r * h_n)
        h_new = (1.0 - z) * n + z * h
        return h_new, None

    h0 = jnp.zeros((B, H), jnp.float32)
    h_final, _ = jax.lax.scan(step, h0, jnp.transpose(x, (1, 0, 2)))
    return h_final


if __name__ == "__main__":
    # Small shapes consistent with the module: batch=2, seq=8, in_dim=16, hidden=32
    B, T, D, H = 2, 8, 16, 32

    key = jax.random.PRNGKey(0)
    kx, k1, k2, k3, k4 = jax.random.split(key, 5)

    x = jax.random.normal(kx, (B, T, D), dtype=jnp.float32)
    # Deterministic parameter init (PyTorch GRU param shapes, gate order [r, z, n]).
    scale = 1.0 / jnp.sqrt(H)
    w_ih = jax.random.uniform(k1, (3 * H, D), jnp.float32, -scale, scale)
    w_hh = jax.random.uniform(k2, (3 * H, H), jnp.float32, -scale, scale)
    b_ih = jax.random.uniform(k3, (3 * H,), jnp.float32, -scale, scale)
    b_hh = jax.random.uniform(k4, (3 * H,), jnp.float32, -scale, scale)

    out = question_encoder_forward(x, w_ih, w_hh, b_ih, b_hh)
    out = jax.block_until_ready(out)

    ref = jax.block_until_ready(_gru_reference(x, w_ih, w_hh, b_ih, b_hh))
    assert out.shape == (B, H)
    assert jnp.allclose(out, ref, atol=1e-5, rtol=1e-5), "Pallas GRU mismatch vs reference"

    # TODO(synk): bidirectional path raises NotImplementedError in the reference
    # module (and the LSTM variant is not the configured default), so neither is
    # implemented here.
    print("KERNEL_OK")
</pallas_src>

<mosaic_0001>
module attributes {stable_mosaic.version = 11 : i64} {
  func.func @_gru_kernel(%arg0: memref<64x128xf32, #tpu.memory_space<vmem>>, %arg1: memref<128x384xf32, #tpu.memory_space<vmem>>, %arg2: memref<128x384xf32, #tpu.memory_space<vmem>>, %arg3: memref<1x384xf32, #tpu.memory_space<vmem>>, %arg4: memref<1x128xf32, #tpu.memory_space<vmem>>, %arg5: memref<8x128xf32, #tpu.memory_space<vmem>>, %arg6: memref<64x384xf32, #tpu.memory_space<vmem>>) attributes {dimension_semantics = [], scalar_prefetch = 0 : i64, scratch_operands = 1 : i64, tpu.core_type = #tpu.core_type<tc>} {
    %c0 = arith.constant 0 : index
    %c0_0 = arith.constant 0 : index
    %0 = vector.load %arg0[%c0, %c0_0] : memref<64x128xf32, #tpu.memory_space<vmem>>, vector<64x128xf32>
    %c0_1 = arith.constant 0 : index
    %c0_2 = arith.constant 0 : index
    %1 = vector.load %arg1[%c0_1, %c0_2] : memref<128x384xf32, #tpu.memory_space<vmem>>, vector<128x384xf32>
    %cst = arith.constant dense<0.000000e+00> : vector<64x384xf32>
    %2 = tpu.matmul %0, %1, %cst {dimension_numbers = #tpu.dot_dimension_numbers<[1], [0], [0], [1], [0, 0, 1, 1], [], []>} : vector<64x128xf32>, vector<128x384xf32>, vector<64x384xf32> -> vector<64x384xf32>
    %c0_3 = arith.constant 0 : index
    %c0_4 = arith.constant 0 : index
    %3 = vector.load %arg3[%c0_3, %c0_4] : memref<1x384xf32, #tpu.memory_space<vmem>>, vector<1x384xf32>
    %4 = vector.broadcast %3 : vector<1x384xf32> to vector<64x384xf32>
    %5 = arith.addf %2, %4 : vector<64x384xf32>
    %c0_5 = arith.constant 0 : index
    %c0_6 = arith.constant 0 : index
    %6 = vector.load %arg6[%c0_5, %c0_6] : memref<64x384xf32, #tpu.memory_space<vmem>>, vector<64x384xf32>
    tpu.vector_store %arg6[%c0_5, %c0_6], %5 {strides = array<i32>} : memref<64x384xf32, #tpu.memory_space<vmem>>, vector<64x384xf32>,
    %c0_7 = arith.constant 0 : index
    %c0_8 = arith.constant 0 : index
    %7 = vector.load %arg2[%c0_7, %c0_8] : memref<128x384xf32, #tpu.memory_space<vmem>>, vector<128x384xf32>
    %c0_9 = arith.constant 0 : index
    %c0_10 = arith.constant 0 : index
    %8 = vector.load %arg4[%c0_9, %c0_10] : memref<1x128xf32, #tpu.memory_space<vmem>>, vector<1x128xf32>
    %cst_11 = arith.constant 0.000000e+00 : f32
    %9 = vector.broadcast %cst_11 : f32 to vector<8x128xf32>
    %c0_i32 = arith.constant 0 : i32
    %c8_i32 = arith.constant 8 : i32
    %10 = arith.muli %c0_i32, %c8_i32 : i32
    %11 = tpu.assume_multiple %10, 8 : i32
    %12 = arith.index_cast %11 : i32 to index
    %c0_12 = arith.constant 0 : index
    %13 = vector.load %arg6[%12, %c0_12] : memref<64x384xf32, #tpu.memory_space<vmem>>, vector<8x384xf32>
    %cst_13 = arith.constant dense<0.000000e+00> : vector<8x384xf32>
    %14 = tpu.matmul %9, %7, %cst_13 {dimension_numbers = #tpu.dot_dimension_numbers<[1], [0], [0], [1], [0, 0, 1, 1], [], []>} : vector<8x128xf32>, vector<128x384xf32>, vector<8x384xf32> -> vector<8x384xf32>
    %15 = vector.extract_strided_slice %13 {offsets = [0, 0], sizes = [8, 128], strides = [1, 1]} : vector<8x384xf32> to vector<8x128xf32>
    %16 = vector.extract_strided_slice %14 {offsets = [0, 0], sizes = [8, 128], strides = [1, 1]} : vector<8x384xf32> to vector<8x128xf32>
    %17 = arith.addf %15, %16 : vector<8x128xf32>
    %18 = arith.negf %17 : vector<8x128xf32>
    %19 = math.exp %18 : vector<8x128xf32>
    %cst_14 = arith.constant 1.000000e+00 : f32
    %20 = vector.broadcast %cst_14 : f32 to vector<8x128xf32>
    %21 = arith.addf %20, %19 : vector<8x128xf32>
    %22 = arith.divf %20, %21 : vector<8x128xf32>
    %23 = vector.extract_strided_slice %13 {offsets = [0, 128], sizes = [8, 128], strides = [1, 1]} : vector<8x384xf32> to vector<8x128xf32>
    %24 = vector.extract_strided_slice %14 {offsets = [0, 128], sizes = [8, 128], strides = [1, 1]} : vector<8x384xf32> to vector<8x128xf32>
    %25 = arith.addf %23, %24 : vector<8x128xf32>
    %26 = arith.negf %25 : vector<8x128xf32>
    %27 = math.exp %26 : vector<8x128xf32>
    %cst_15 = arith.constant 1.000000e+00 : f32
    %28 = vector.broadcast %cst_15 : f32 to vector<8x128xf32>
    %29 = arith.addf %28, %27 : vector<8x128xf32>
    %30 = arith.divf %28, %29 : vector<8x128xf32>
    %31 = vector.extract_strided_slice %13 {offsets = [0, 256], sizes = [8, 128], strides = [1, 1]} : vector<8x384xf32> to vector<8x128xf32>
    %32 = vector.extract_strided_slice %14 {offsets = [0, 256], sizes = [8, 128], strides = [1, 1]} : vector<8x384xf32> to vector<8x128xf32>
    %33 = vector.broadcast %8 : vector<1x128xf32> to vector<8x128xf32>
    %34 = arith.addf %32, %33 : vector<8x128xf32>
    %35 = arith.mulf %22, %34 : vector<8x128xf32>
    %36 = arith.addf %31, %35 : vector<8x128xf32>
    %37 = math.tanh %36 : vector<8x128xf32>
    %cst_16 = arith.constant 1.000000e+00 : f32
    %38 = vector.broadcast %cst_16 : f32 to vector<8x128xf32>
    %39 = arith.subf %38, %30 : vector<8x128xf32>
    %40 = arith.mulf %39, %37 : vector<8x128xf32>
    %41 = arith.mulf %30, %9 : vector<8x128xf32>
    %42 = arith.addf %40, %41 : vector<8x128xf32>
    %c1_i32 = arith.constant 1 : i32
    %c8_i32_17 = arith.constant 8 : i32
    %43 = arith.muli %c1_i32, %c8_i32_17 : i32
    %44 = tpu.assume_multiple %43, 8 : i32
    %45 = arith.index_cast %44 : i32 to index
    %c0_18 = arith.constant 0 : index
    %46 = vector.load %arg6[%45, %c0_18] : memref<64x384xf32, #tpu.memory_space<vmem>>, vector<8x384xf32>
    %cst_19 = arith.constant dense<0.000000e+00> : vector<8x384xf32>
    %47 = tpu.matmul %42, %7, %cst_19 {dimension_numbers = #tpu.dot_dimension_numbers<[1], [0], [0], [1], [0, 0, 1, 1], [], []>} : vector<8x128xf32>, vector<128x384xf32>, vector<8x384xf32> -> vector<8x384xf32>
    %48 = vector.extract_strided_slice %46 {offsets = [0, 0], sizes = [8, 128], strides = [1, 1]} : vector<8x384xf32> to vector<8x128xf32>
    %49 = vector.extract_strided_slice %47 {offsets = [0, 0], sizes = [8, 128], strides = [1, 1]} : vector<8x384xf32> to vector<8x128xf32>
    %50 = arith.addf %48, %49 : vector<8x128xf32>
    %51 = arith.negf %50 : vector<8x128xf32>
    %52 = math.exp %51 : vector<8x128xf32>
    %cst_20 = arith.constant 1.000000e+00 : f32
    %53 = vector.broadcast %cst_20 : f32 to vector<8x128xf32>
    %54 = arith.addf %53, %52 : vector<8x128xf32>
    %55 = arith.divf %53, %54 : vector<8x128xf32>
    %56 = vector.extract_strided_slice %46 {offsets = [0, 128], sizes = [8, 128], strides = [1, 1]} : vector<8x384xf32> to vector<8x128xf32>
    %57 = vector.extract_strided_slice %47 {offsets = [0, 128], sizes = [8, 128], strides = [1, 1]} : vector<8x384xf32> to vector<8x128xf32>
    %58 = arith.addf %56, %57 : vector<8x128xf32>
    %59 = arith.negf %58 : vector<8x128xf32>
    %60 = math.exp %59 : vector<8x128xf32>
    %cst_21 = arith.constant 1.000000e+00 : f32
    %61 = vector.broadcast %cst_21 : f32 to vector<8x128xf32>
    %62 = arith.addf %61, %60 : vector<8x128xf32>
    %63 = arith.divf %61, %62 : vector<8x128xf32>
    %64 = vector.extract_strided_slice %46 {offsets = [0, 256], sizes = [8, 128], strides = [1, 1]} : vector<8x384xf32> to vector<8x128xf32>
    %65 = vector.extract_strided_slice %47 {offsets = [0, 256], sizes = [8, 128], strides = [1, 1]} : vector<8x384xf32> to vector<8x128xf32>
    %66 = vector.broadcast %8 : vector<1x128xf32> to vector<8x128xf32>
    %67 = arith.addf %65, %66 : vector<8x128xf32>
    %68 = arith.mulf %55, %67 : vector<8x128xf32>
    %69 = arith.addf %64, %68 : vector<8x128xf32>
    %70 = math.tanh %69 : vector<8x128xf32>
    %cst_22 = arith.constant 1.000000e+00 : f32
    %71 = vector.broadcast %cst_22 : f32 to vector<8x128xf32>
    %72 = arith.subf %71, %63 : vector<8x128xf32>
    %73 = arith.mulf %72, %70 : vector<8x128xf32>
    %74 = arith.mulf %63, %42 : vector<8x128xf32>
    %75 = arith.addf %73, %74 : vector<8x128xf32>
    %c2_i32 = arith.constant 2 : i32
    %c8_i32_23 = arith.constant 8 : i32
    %76 = arith.muli %c2_i32, %c8_i32_23 : i32
    %77 = tpu.assume_multiple %76, 8 : i32
    %78 = arith.index_cast %77 : i32 to index
    %c0_24 = arith.constant 0 : index
    %79 = vector.load %arg6[%78, %c0_24] : memref<64x384xf32, #tpu.memory_space<vmem>>, vector<8x384xf32>
    %cst_25 = arith.constant dense<0.000000e+00> : vector<8x384xf32>
    %80 = tpu.matmul %75, %7, %cst_25 {dimension_numbers = #tpu.dot_dimension_numbers<[1], [0], [0], [1], [0, 0, 1, 1], [], []>} : vector<8x128xf32>, vector<128x384xf32>, vector<8x384xf32> -> vector<8x384xf32>
    %81 = vector.extract_strided_slice %79 {offsets = [0, 0], sizes = [8, 128], strides = [1, 1]} : vector<8x384xf32> to vector<8x128xf32>
    %82 = vector.extract_strided_slice %80 {offsets = [0, 0], sizes = [8, 128], strides = [1, 1]} : vector<8x384xf32> to vector<8x128xf32>
    %83 = arith.addf %81, %82 : vector<8x128xf32>
    %84 = arith.negf %83 : vector<8x128xf32>
    %85 = math.exp %84 : vector<8x128xf32>
    %cst_26 = arith.constant 1.000000e+00 : f32
    %86 = vector.broadcast %cst_26 : f32 to vector<8x128xf32>
    %87 = arith.addf %86, %85 : vector<8x128xf32>
    %88 = arith.divf %86, %87 : vector<8x128xf32>
    %89 = vector.extract_strided_slice %79 {offsets = [0, 128], sizes = [8, 128], strides = [1, 1]} : vector<8x384xf32> to vector<8x128xf32>
    %90 = vector.extract_strided_slice %80 {offsets = [0, 128], sizes = [8, 128], strides = [1, 1]} : vector<8x384xf32> to vector<8x128xf32>
    %91 = arith.addf %89, %90 : vector<8x128xf32>
    %92 = arith.negf %91 : vector<8x128xf32>
    %93 = math.exp %92 : vector<8x128xf32>
    %cst_27 = arith.constant 1.000000e+00 : f32
    %94 = vector.broadcast %cst_27 : f32 to vector<8x128xf32>
    %95 = arith.addf %94, %93 : vector<8x128xf32>
    %96 = arith.divf %94, %95 : vector<8x128xf32>
    %97 = vector.extract_strided_slice %79 {offsets = [0, 256], sizes = [8, 128], strides = [1, 1]} : vector<8x384xf32> to vector<8x128xf32>
    %98 = vector.extract_strided_slice %80 {offsets = [0, 256], sizes = [8, 128], strides = [1, 1]} : vector<8x384xf32> to vector<8x128xf32>
    %99 = vector.broadcast %8 : vector<1x128xf32> to vector<8x128xf32>
    %100 = arith.addf %98, %99 : vector<8x128xf32>
    %101 = arith.mulf %88, %100 : vector<8x128xf32>
    %102 = arith.addf %97, %101 : vector<8x128xf32>
    %103 = math.tanh %102 : vector<8x128xf32>
    %cst_28 = arith.constant 1.000000e+00 : f32
    %104 = vector.broadcast %cst_28 : f32 to vector<8x128xf32>
    %105 = arith.subf %104, %96 : vector<8x128xf32>
    %106 = arith.mulf %105, %103 : vector<8x128xf32>
    %107 = arith.mulf %96, %75 : vector<8x128xf32>
    %108 = arith.addf %106, %107 : vector<8x128xf32>
    %c3_i32 = arith.constant 3 : i32
    %c8_i32_29 = arith.constant 8 : i32
    %109 = arith.muli %c3_i32, %c8_i32_29 : i32
    %110 = tpu.assume_multiple %109, 8 : i32
    %111 = arith.index_cast %110 : i32 to index
    %c0_30 = arith.constant 0 : index
    %112 = vector.load %arg6[%111, %c0_30] : memref<64x384xf32, #tpu.memory_space<vmem>>, vector<8x384xf32>
    %cst_31 = arith.constant dense<0.000000e+00> : vector<8x384xf32>
    %113 = tpu.matmul %108, %7, %cst_31 {dimension_numbers = #tpu.dot_dimension_numbers<[1], [0], [0], [1], [0, 0, 1, 1], [], []>} : vector<8x128xf32>, vector<128x384xf32>, vector<8x384xf32> -> vector<8x384xf32>
    %114 = vector.extract_strided_slice %112 {offsets = [0, 0], sizes = [8, 128], strides = [1, 1]} : vector<8x384xf32> to vector<8x128xf32>
    %115 = vector.extract_strided_slice %113 {offsets = [0, 0], sizes = [8, 128], strides = [1, 1]} : vector<8x384xf32> to vector<8x128xf32>
    %116 = arith.addf %114, %115 : vector<8x128xf32>
    %117 = arith.negf %116 : vector<8x128xf32>
    %118 = math.exp %117 : vector<8x128xf32>
    %cst_32 = arith.constant 1.000000e+00 : f32
    %119 = vector.broadcast %cst_32 : f32 to vector<8x128xf32>
    %120 = arith.addf %119, %118 : vector<8x128xf32>
    %121 = arith.divf %119, %120 : vector<8x128xf32>
    %122 = vector.extract_strided_slice %112 {offsets = [0, 128], sizes = [8, 128], strides = [1, 1]} : vector<8x384xf32> to vector<8x128xf32>
    %123 = vector.extract_strided_slice %113 {offsets = [0, 128], sizes = [8, 128], strides = [1, 1]} : vector<8x384xf32> to vector<8x128xf32>
    %124 = arith.addf %122, %123 : vector<8x128xf32>
    %125 = arith.negf %124 : vector<8x128xf32>
    %126 = math.exp %125 : vector<8x128xf32>
    %cst_33 = arith.constant 1.000000e+00 : f32
    %127 = vector.broadcast %cst_33 : f32 to vector<8x128xf32>
    %128 = arith.addf %127, %126 : vector<8x128xf32>
    %129 = arith.divf %127, %128 : vector<8x128xf32>
    %130 = vector.extract_strided_slice %112 {offsets = [0, 256], sizes = [8, 128], strides = [1, 1]} : vector<8x384xf32> to vector<8x128xf32>
    %131 = vector.extract_strided_slice %113 {offsets = [0, 256], sizes = [8, 128], strides = [1, 1]} : vector<8x384xf32> to vector<8x128xf32>
    %132 = vector.broadcast %8 : vector<1x128xf32> to vector<8x128xf32>
    %133 = arith.addf %131, %132 : vector<8x128xf32>
    %134 = arith.mulf %121, %133 : vector<8x128xf32>
    %135 = arith.addf %130, %134 : vector<8x128xf32>
    %136 = math.tanh %135 : vector<8x128xf32>
    %cst_34 = arith.constant 1.000000e+00 : f32
    %137 = vector.broadcast %cst_34 : f32 to vector<8x128xf32>
    %138 = arith.subf %137, %129 : vector<8x128xf32>
    %139 = arith.mulf %138, %136 : vector<8x128xf32>
    %140 = arith.mulf %129, %108 : vector<8x128xf32>
    %141 = arith.addf %139, %140 : vector<8x128xf32>
    %c4_i32 = arith.constant 4 : i32
    %c8_i32_35 = arith.constant 8 : i32
    %142 = arith.muli %c4_i32, %c8_i32_35 : i32
    %143 = tpu.assume_multiple %142, 8 : i32
    %144 = arith.index_cast %143 : i32 to index
    %c0_36 = arith.constant 0 : index
    %145 = vector.load %arg6[%144, %c0_36] : memref<64x384xf32, #tpu.memory_space<vmem>>, vector<8x384xf32>
    %cst_37 = arith.constant dense<0.000000e+00> : vector<8x384xf32>
    %146 = tpu.matmul %141, %7, %cst_37 {dimension_numbers = #tpu.dot_dimension_numbers<[1], [0], [0], [1], [0, 0, 1, 1], [], []>} : vector<8x128xf32>, vector<128x384xf32>, vector<8x384xf32> -> vector<8x384xf32>
    %147 = vector.extract_strided_slice %145 {offsets = [0, 0], sizes = [8, 128], strides = [1, 1]} : vector<8x384xf32> to vector<8x128xf32>
    %148 = vector.extract_strided_slice %146 {offsets = [0, 0], sizes = [8, 128], strides = [1, 1]} : vector<8x384xf32> to vector<8x128xf32>
    %149 = arith.addf %147, %148 : vector<8x128xf32>
    %150 = arith.negf %149 : vector<8x128xf32>
    %151 = math.exp %150 : vector<8x128xf32>
    %cst_38 = arith.constant 1.000000e+00 : f32
    %152 = vector.broadcast %cst_38 : f32 to vector<8x128xf32>
    %153 = arith.addf %152, %151 : vector<8x128xf32>
    %154 = arith.divf %152, %153 : vector<8x128xf32>
    %155 = vector.extract_strided_slice %145 {offsets = [0, 128], sizes = [8, 128], strides = [1, 1]} : vector<8x384xf32> to vector<8x128xf32>
    %156 = vector.extract_strided_slice %146 {offsets = [0, 128], sizes = [8, 128], strides = [1, 1]} : vector<8x384xf32> to vector<8x128xf32>
    %157 = arith.addf %155, %156 : vector<8x128xf32>
    %158 = arith.negf %157 : vector<8x128xf32>
    %159 = math.exp %158 : vector<8x128xf32>
    %cst_39 = arith.constant 1.000000e+00 : f32
    %160 = vector.broadcast %cst_39 : f32 to vector<8x128xf32>
    %161 = arith.addf %160, %159 : vector<8x128xf32>
    %162 = arith.divf %160, %161 : vector<8x128xf32>
    %163 = vector.extract_strided_slice %145 {offsets = [0, 256], sizes = [8, 128], strides = [1, 1]} : vector<8x384xf32> to vector<8x128xf32>
    %164 = vector.extract_strided_slice %146 {offsets = [0, 256], sizes = [8, 128], strides = [1, 1]} : vector<8x384xf32> to vector<8x128xf32>
    %165 = vector.broadcast %8 : vector<1x128xf32> to vector<8x128xf32>
    %166 = arith.addf %164, %165 : vector<8x128xf32>
    %167 = arith.mulf %154, %166 : vector<8x128xf32>
    %168 = arith.addf %163, %167 : vector<8x128xf32>
    %169 = math.tanh %168 : vector<8x128xf32>
    %cst_40 = arith.constant 1.000000e+00 : f32
    %170 = vector.broadcast %cst_40 : f32 to vector<8x128xf32>
    %171 = arith.subf %170, %162 : vector<8x128xf32>
    %172 = arith.mulf %171, %169 : vector<8x128xf32>
    %173 = arith.mulf %162, %141 : vector<8x128xf32>
    %174 = arith.addf %172, %173 : vector<8x128xf32>
    %c5_i32 = arith.constant 5 : i32
    %c8_i32_41 = arith.constant 8 : i32
    %175 = arith.muli %c5_i32, %c8_i32_41 : i32
    %176 = tpu.assume_multiple %175, 8 : i32
    %177 = arith.index_cast %176 : i32 to index
    %c0_42 = arith.constant 0 : index
    %178 = vector.load %arg6[%177, %c0_42] : memref<64x384xf32, #tpu.memory_space<vmem>>, vector<8x384xf32>
    %cst_43 = arith.constant dense<0.000000e+00> : vector<8x384xf32>
    %179 = tpu.matmul %174, %7, %cst_43 {dimension_numbers = #tpu.dot_dimension_numbers<[1], [0], [0], [1], [0, 0, 1, 1], [], []>} : vector<8x128xf32>, vector<128x384xf32>, vector<8x384xf32> -> vector<8x384xf32>
    %180 = vector.extract_strided_slice %178 {offsets = [0, 0], sizes = [8, 128], strides = [1, 1]} : vector<8x384xf32> to vector<8x128xf32>
    %181 = vector.extract_strided_slice %179 {offsets = [0, 0], sizes = [8, 128], strides = [1, 1]} : vector<8x384xf32> to vector<8x128xf32>
    %182 = arith.addf %180, %181 : vector<8x128xf32>
    %183 = arith.negf %182 : vector<8x128xf32>
    %184 = math.exp %183 : vector<8x128xf32>
    %cst_44 = arith.constant 1.000000e+00 : f32
    %185 = vector.broadcast %cst_44 : f32 to vector<8x128xf32>
    %186 = arith.addf %185, %184 : vector<8x128xf32>
    %187 = arith.divf %185, %186 : vector<8x128xf32>
    %188 = vector.extract_strided_slice %178 {offsets = [0, 128], sizes = [8, 128], strides = [1, 1]} : vector<8x384xf32> to vector<8x128xf32>
    %189 = vector.extract_strided_slice %179 {offsets = [0, 128], sizes = [8, 128], strides = [1, 1]} : vector<8x384xf32> to vector<8x128xf32>
    %190 = arith.addf %188, %189 : vector<8x128xf32>
    %191 = arith.negf %190 : vector<8x128xf32>
    %192 = math.exp %191 : vector<8x128xf32>
    %cst_45 = arith.constant 1.000000e+00 : f32
    %193 = vector.broadcast %cst_45 : f32 to vector<8x128xf32>
    %194 = arith.addf %193, %192 : vector<8x128xf32>
    %195 = arith.divf %193, %194 : vector<8x128xf32>
    %196 = vector.extract_strided_slice %178 {offsets = [0, 256], sizes = [8, 128], strides = [1, 1]} : vector<8x384xf32> to vector<8x128xf32>
    %197 = vector.extract_strided_slice %179 {offsets = [0, 256], sizes = [8, 128], strides = [1, 1]} : vector<8x384xf32> to vector<8x128xf32>
    %198 = vector.broadcast %8 : vector<1x128xf32> to vector<8x128xf32>
    %199 = arith.addf %197, %198 : vector<8x128xf32>
    %200 = arith.mulf %187, %199 : vector<8x128xf32>
    %201 = arith.addf %196, %200 : vector<8x128xf32>
    %202 = math.tanh %201 : vector<8x128xf32>
    %cst_46 = arith.constant 1.000000e+00 : f32
    %203 = vector.broadcast %cst_46 : f32 to vector<8x128xf32>
    %204 = arith.subf %203, %195 : vector<8x128xf32>
    %205 = arith.mulf %204, %202 : vector<8x128xf32>
    %206 = arith.mulf %195, %174 : vector<8x128xf32>
    %207 = arith.addf %205, %206 : vector<8x128xf32>
    %c6_i32 = arith.constant 6 : i32
    %c8_i32_47 = arith.constant 8 : i32
    %208 = arith.muli %c6_i32, %c8_i32_47 : i32
    %209 = tpu.assume_multiple %208, 8 : i32
    %210 = arith.index_cast %209 : i32 to index
    %c0_48 = arith.constant 0 : index
    %211 = vector.load %arg6[%210, %c0_48] : memref<64x384xf32, #tpu.memory_space<vmem>>, vector<8x384xf32>
    %cst_49 = arith.constant dense<0.000000e+00> : vector<8x384xf32>
    %212 = tpu.matmul %207, %7, %cst_49 {dimension_numbers = #tpu.dot_dimension_numbers<[1], [0], [0], [1], [0, 0, 1, 1], [], []>} : vector<8x128xf32>, vector<128x384xf32>, vector<8x384xf32> -> vector<8x384xf32>
    %213 = vector.extract_strided_slice %211 {offsets = [0, 0], sizes = [8, 128], strides = [1, 1]} : vector<8x384xf32> to vector<8x128xf32>
    %214 = vector.extract_strided_slice %212 {offsets = [0, 0], sizes = [8, 128], strides = [1, 1]} : vector<8x384xf32> to vector<8x128xf32>
    %215 = arith.addf %213, %214 : vector<8x128xf32>
    %216 = arith.negf %215 : vector<8x128xf32>
    %217 = math.exp %216 : vector<8x128xf32>
    %cst_50 = arith.constant 1.000000e+00 : f32
    %218 = vector.broadcast %cst_50 : f32 to vector<8x128xf32>
    %219 = arith.addf %218, %217 : vector<8x128xf32>
    %220 = arith.divf %218, %219 : vector<8x128xf32>
    %221 = vector.extract_strided_slice %211 {offsets = [0, 128], sizes = [8, 128], strides = [1, 1]} : vector<8x384xf32> to vector<8x128xf32>
    %222 = vector.extract_strided_slice %212 {offsets = [0, 128], sizes = [8, 128], strides = [1, 1]} : vector<8x384xf32> to vector<8x128xf32>
    %223 = arith.addf %221, %222 : vector<8x128xf32>
    %224 = arith.negf %223 : vector<8x128xf32>
    %225 = math.exp %224 : vector<8x128xf32>
    %cst_51 = arith.constant 1.000000e+00 : f32
    %226 = vector.broadcast %cst_51 : f32 to vector<8x128xf32>
    %227 = arith.addf %226, %225 : vector<8x128xf32>
    %228 = arith.divf %226, %227 : vector<8x128xf32>
    %229 = vector.extract_strided_slice %211 {offsets = [0, 256], sizes = [8, 128], strides = [1, 1]} : vector<8x384xf32> to vector<8x128xf32>
    %230 = vector.extract_strided_slice %212 {offsets = [0, 256], sizes = [8, 128], strides = [1, 1]} : vector<8x384xf32> to vector<8x128xf32>
    %231 = vector.broadcast %8 : vector<1x128xf32> to vector<8x128xf32>
    %232 = arith.addf %230, %231 : vector<8x128xf32>
    %233 = arith.mulf %220, %232 : vector<8x128xf32>
    %234 = arith.addf %229, %233 : vector<8x128xf32>
    %235 = math.tanh %234 : vector<8x128xf32>
    %cst_52 = arith.constant 1.000000e+00 : f32
    %236 = vector.broadcast %cst_52 : f32 to vector<8x128xf32>
    %237 = arith.subf %236, %228 : vector<8x128xf32>
    %238 = arith.mulf %237, %235 : vector<8x128xf32>
    %239 = arith.mulf %228, %207 : vector<8x128xf32>
    %240 = arith.addf %238, %239 : vector<8x128xf32>
    %c7_i32 = arith.constant 7 : i32
    %c8_i32_53 = arith.constant 8 : i32
    %241 = arith.muli %c7_i32, %c8_i32_53 : i32
    %242 = tpu.assume_multiple %241, 8 : i32
    %243 = arith.index_cast %242 : i32 to index
    %c0_54 = arith.constant 0 : index
    %244 = vector.load %arg6[%243, %c0_54] : memref<64x384xf32, #tpu.memory_space<vmem>>, vector<8x384xf32>
    %cst_55 = arith.constant dense<0.000000e+00> : vector<8x384xf32>
    %245 = tpu.matmul %240, %7, %cst_55 {dimension_numbers = #tpu.dot_dimension_numbers<[1], [0], [0], [1], [0, 0, 1, 1], [], []>} : vector<8x128xf32>, vector<128x384xf32>, vector<8x384xf32> -> vector<8x384xf32>
    %246 = vector.extract_strided_slice %244 {offsets = [0, 0], sizes = [8, 128], strides = [1, 1]} : vector<8x384xf32> to vector<8x128xf32>
    %247 = vector.extract_strided_slice %245 {offsets = [0, 0], sizes = [8, 128], strides = [1, 1]} : vector<8x384xf32> to vector<8x128xf32>
    %248 = arith.addf %246, %247 : vector<8x128xf32>
    %249 = arith.negf %248 : vector<8x128xf32>
    %250 = math.exp %249 : vector<8x128xf32>
    %cst_56 = arith.constant 1.000000e+00 : f32
    %251 = vector.broadcast %cst_56 : f32 to vector<8x128xf32>
    %252 = arith.addf %251, %250 : vector<8x128xf32>
    %253 = arith.divf %251, %252 : vector<8x128xf32>
    %254 = vector.extract_strided_slice %244 {offsets = [0, 128], sizes = [8, 128], strides = [1, 1]} : vector<8x384xf32> to vector<8x128xf32>
    %255 = vector.extract_strided_slice %245 {offsets = [0, 128], sizes = [8, 128], strides = [1, 1]} : vector<8x384xf32> to vector<8x128xf32>
    %256 = arith.addf %254, %255 : vector<8x128xf32>
    %257 = arith.negf %256 : vector<8x128xf32>
    %258 = math.exp %257 : vector<8x128xf32>
    %cst_57 = arith.constant 1.000000e+00 : f32
    %259 = vector.broadcast %cst_57 : f32 to vector<8x128xf32>
    %260 = arith.addf %259, %258 : vector<8x128xf32>
    %261 = arith.divf %259, %260 : vector<8x128xf32>
    %262 = vector.extract_strided_slice %244 {offsets = [0, 256], sizes = [8, 128], strides = [1, 1]} : vector<8x384xf32> to vector<8x128xf32>
    %263 = vector.extract_strided_slice %245 {offsets = [0, 256], sizes = [8, 128], strides = [1, 1]} : vector<8x384xf32> to vector<8x128xf32>
    %264 = vector.broadcast %8 : vector<1x128xf32> to vector<8x128xf32>
    %265 = arith.addf %263, %264 : vector<8x128xf32>
    %266 = arith.mulf %253, %265 : vector<8x128xf32>
    %267 = arith.addf %262, %266 : vector<8x128xf32>
    %268 = math.tanh %267 : vector<8x128xf32>
    %cst_58 = arith.constant 1.000000e+00 : f32
    %269 = vector.broadcast %cst_58 : f32 to vector<8x128xf32>
    %270 = arith.subf %269, %261 : vector<8x128xf32>
    %271 = arith.mulf %270, %268 : vector<8x128xf32>
    %272 = arith.mulf %261, %240 : vector<8x128xf32>
    %273 = arith.addf %271, %272 : vector<8x128xf32>
    %c8_i32_59 = arith.constant 8 : i32
    %c0_60 = arith.constant 0 : index
    %c0_61 = arith.constant 0 : index
    %274 = vector.load %arg5[%c0_60, %c0_61] : memref<8x128xf32, #tpu.memory_space<vmem>>, vector<8x128xf32>
    tpu.vector_store %arg5[%c0_60, %c0_61], %273 {strides = array<i32>} : memref<8x128xf32, #tpu.memory_space<vmem>>, vector<8x128xf32>,
    return
  }
}

</mosaic_0001>

<bundles_post_ra>
// kernel: tpu_custom_call.1
= control target key start
LH: loop header
LB: loop body
LE: loop exit
PB: predicated region body
PF: predicated region fallthrough
CT: control target
= control target key end

     0   :  { %10 = vsyncpa [#allocation4], 0  ;;  %s3532_s0 = inlined_call_operand.hbm [shape: f32[64,128], index: 0, kind: input, shape index: {}]   ;;  %s3533_s1 = inlined_call_operand.hbm [shape: f32[128,384], index: 1, kind: input, shape index: {}]   ;;  %s3534_s2 = inlined_call_operand.hbm [shape: f32[128,384], index: 2, kind: input, shape index: {}]   ;;  %s3535_s3 = inlined_call_operand.vmem [shape: f32[1,384], index: 3, kind: input, shape index: {}]   ;;  %s3536_s4 = inlined_call_operand.vmem [shape: f32[1,128], index: 4, kind: input, shape index: {}]   ;;  %s3537_s5 = inlined_call_operand.hbm [shape: f32[8,128], index: 5, kind: output, shape index: {}]  }
   0x1   :  { %11 = vsyncpa [#allocation7], 0 }
   0x2   :  { %12 = vsyncpa [#allocation5], 0  ;;  %s3038_s18 = smov [#allocation6]   ;;  %s2944_s22 = scalar_lea.hbm %s3533_s1, 6144 }
   0x3   :  { %s30_s19 = sshll.u32 %s3038_s18, 4  ;;  %p2945_p0 = scmp.ne.s32.totalorder %s3533_s1, %s2944_s22  ;;  %s31_s19 = int_to_ptr.vmem [resolvable:$true] %s30_s19 }
   0x4   :  { %p2948_p1 = scmp.lt.u32.totalorder %s2944_s22, %s3533_s1 }
   0x6   :  { %p2950_p2 = pnand %p2948_p1, %p2945_p0 }
   0x8   :  { %2953 = shalt.err (!%p2950_p2)
}
   0x9   :  { %s2954_s27 = scalar_lea.vmem %s31_s19, 6144  ;;  %p2959_p4 = scmp.lt.s32.totalorder %s31_s19, %s31_s19 }
   0xa   :  { %p2955_p3 = scmp.ne.s32.totalorder %s31_s19, %s2954_s27  ;;  %p2960_p5 = scmp.lt.s32.totalorder %s2954_s27, %s2954_s27 }
   0xc   :  { %p2961_p6 = por %p2960_p5, %p2959_p4 }
   0xe   :  { %p2962_p7 = pnand %p2961_p6, %p2955_p3 }
  0x10   :  { %2965 = shalt.err (!%p2962_p7)
}
  0x11   :  { %s3039_s28 = smov 384   ;;  %s3040_s29 = smov 24  }
  0x12   :  { %36 = dma.hbm_to_vmem [thread:$0]  %s3533_s1, 6144, %s31_s19, [#allocation7], %s3039_s28, %s3039_s28, %s3040_s29  }
  0x13   :  { %s3041_s7 = smov [#allocation3]   ;;  %s2966_s11 = scalar_lea.hbm %s3532_s0, 1024 }
  0x14   :  { %s18_s8 = sshll.u32 %s3041_s7, 4  ;;  %p2967_p8 = scmp.ne.s32.totalorder %s3532_s0, %s2966_s11  ;;  %s19_s8 = int_to_ptr.vmem [resolvable:$true] %s18_s8 }
  0x15   :  { %p2970_p9 = scmp.lt.u32.totalorder %s2966_s11, %s3532_s0 }
  0x17   :  { %p2972_p10 = pnand %p2970_p9, %p2967_p8 }
  0x19   :  { %2975 = shalt.err (!%p2972_p10)
}
  0x1a   :  { %s2976_s16 = scalar_lea.vmem %s19_s8, 1024  ;;  %p2981_p12 = scmp.lt.s32.totalorder %s19_s8, %s19_s8 }
  0x1b   :  { %p2977_p11 = scmp.ne.s32.totalorder %s19_s8, %s2976_s16  ;;  %p2982_p13 = scmp.lt.s32.totalorder %s2976_s16, %s2976_s16 }
  0x1d   :  { %p2983_p0 = por %p2982_p13, %p2981_p12 }
  0x1f   :  { %p2984_p1 = pnand %p2983_p0, %p2977_p11 }
  0x21   :  { %2987 = shalt.err (!%p2984_p1)
}
  0x22   :  { %s3042_s1 = smov 128   ;;  %s3043_s17 = smov 8  }
  0x23   :  { %24 = dma.hbm_to_vmem [thread:$0]  %s3532_s0, 1024, %s19_s8, [#allocation4], %s3042_s1, %s3042_s1, %s3043_s17  }
  0x24   :  { %s3044_s20 = smov [#allocation8]   ;;  %s2988_s24 = scalar_lea.hbm %s3534_s2, 6144 }
  0x25   :  { %s42_s21 = sshll.u32 %s3044_s20, 4  ;;  %p2989_p2 = scmp.ne.s32.totalorder %s3534_s2, %s2988_s24  ;;  %s43_s21 = int_to_ptr.vmem [resolvable:$true] %s42_s21 }
  0x26   :  { %p2992_p3 = scmp.lt.u32.totalorder %s2988_s24, %s3534_s2 }
  0x28   :  { %p2994_p4 = pnand %p2992_p3, %p2989_p2 }
  0x2a   :  { %2997 = shalt.err (!%p2994_p4)
}
  0x2b   :  { %s2998_s6 = scalar_lea.vmem %s43_s21, 6144  ;;  %p3003_p6 = scmp.lt.s32.totalorder %s43_s21, %s43_s21 }
  0x2c   :  { %p2999_p5 = scmp.ne.s32.totalorder %s43_s21, %s2998_s6  ;;  %p3004_p7 = scmp.lt.s32.totalorder %s2998_s6, %s2998_s6 }
  0x2e   :  { %p3005_p8 = por %p3004_p7, %p3003_p6 }
  0x30   :  { %p3006_p9 = pnand %p3005_p8, %p2999_p5 }
  0x32   :  { %3009 = shalt.err (!%p3006_p9)
}
  0x33   :  { %48 = dma.hbm_to_vmem [thread:$0]  %s3534_s2, 6144, %s43_s21, [#allocation7], %s3039_s28, %s3039_s28, %s3040_s29  }
  0x34   :  { %3032 = dma.done.wait [#allocation4], 1024  }
  0x35   :  { %3033 = vsyncadd [#allocation4], 4294966272 }
  0x36   :  { %3034 = dma.done.wait [#allocation7], 12288  }
  0x37   :  { %3035 = vsyncadd [#allocation7], 4294955008  ;;  %v3045_v0 = vmov 0.0   ;;  %v71_v1 = vld [vmem:[#allocation6 + $0x8] sm:$0xff]  ;;  %v74_v2 = vld [vmem:[#allocation6 + $0x20] sm:$0xff]  ;;  %vm3047_vm0 = vmmov 0  }
  0x38   :  { %199 = vmatprep.mubr.f32.mxu0 %v3045_v0  ;;  %v70_v3 = vld [vmem:[#allocation6] sm:$0xff]  ;;  %v2309_v4 = vpack.c.bf16 %v74_v2, %v71_v1  ;;  %v73_v5 = vld [vmem:[#allocation6 + $0x18] sm:$0xff]  ;;  %v80_v7 = vld [vmem:[#allocation6 + $0x50] sm:$0xff] }
  0x39   :  { %v77_v6 = vld [vmem:[#allocation6 + $0x38] sm:$0xff]  ;;  %v2311_v8 = vpack.c.bf16 %v73_v5, %v70_v3  ;;  %v76_v10 = vld [vmem:[#allocation6 + $0x30] sm:$0xff]  ;;  %v79_v11 = vld [vmem:[#allocation6 + $0x48] sm:$0xff] }
  0x3a   :  { %v2313_v9 = vpack.c.bf16 %v80_v7, %v77_v6  ;;  %v83_v12 = vld [vmem:[#allocation6 + $0x68] sm:$0xff]  ;;  %2310 = vmatprep.subr.bf16.mxu0 %v2309_v4  ;;  %v86_v13 = vld [vmem:[#allocation6 + $0x80] sm:$0xff]  ;;  %v2315_v14 = vpack.c.bf16 %v79_v11, %v76_v10  ;;  %v85_v17 = vld [vmem:[#allocation6 + $0x78] sm:$0xff] }
  0x3b   :  { %2312 = vmatpush1.bf16.msra.mxu0 %v2311_v8  ;;  %v2317_v15 = vpack.c.bf16 %v86_v13, %v83_v12  ;;  %v82_v16 = vld [vmem:[#allocation6 + $0x60] sm:$0xff]  ;;  %v89_v18 = vld [vmem:[#allocation6 + $0x98] sm:$0xff]  ;;  %v92_v19 = vld [vmem:[#allocation6 + $0xb0] sm:$0xff] }
  0x3c   :  { %2314 = vmatprep.subr.bf16.mxu0 %v2313_v9  ;;  %v2319_v20 = vpack.c.bf16 %v85_v17, %v82_v16  ;;  %v88_v21 = vld [vmem:[#allocation6 + $0x90] sm:$0xff]  ;;  %v2321_v22 = vpack.c.bf16 %v92_v19, %v89_v18  ;;  %v91_v23 = vld [vmem:[#allocation6 + $0xa8] sm:$0xff]  ;;  %v98_v27 = vld [vmem:[#allocation6 + $0xe0] sm:$0xff] }
  0x3d   :  { %v72_v24 = vld [vmem:[#allocation6 + $0x10] sm:$0xff]  ;;  %v75_v25 = vld [vmem:[#allocation6 + $0x28] sm:$0xff]  ;;  %v78_v29 = vld [vmem:[#allocation6 + $0x40] sm:$0xff]  ;;  %v2323_v31 = vpack.c.bf16 %v91_v23, %v88_v21 }
  0x3e   :  { %v95_v26 = vld [vmem:[#allocation6 + $0xc8] sm:$0xff]  ;;  %v2341_v28 = vpack.c.bf16 %v75_v25, %v72_v24  ;;  %v81_v30 = vld [vmem:[#allocation6 + $0x58] sm:$0xff]  ;;  %v94_v32 = vld [vmem:[#allocation6 + $0xc0] sm:$0xff] }
  0x3f   :  { %2316 = vmatpush1.bf16.msra.mxu0 %v2315_v14  ;;  %v2345_v33 = vpack.c.bf16 %v81_v30, %v78_v29  ;;  %v2325_v34 = vpack.c.bf16 %v98_v27, %v95_v26  ;;  %v97_v35 = vld [vmem:[#allocation6 + $0xd8] sm:$0xff]  ;;  %v3122_v36 = vld [vmem:[#allocation3] sm:$0xff]  ;;  %v84_v37 = vld [vmem:[#allocation6 + $0x70] sm:$0xff] }
  0x40   :  { %2318 = vmatprep.subr.bf16.mxu0 %v2317_v15  ;;  %2342 = vmatprep.subr.bf16.mxu1 %v2341_v28  ;;  %v101_v38 = vld [vmem:[#allocation6 + $0xf8] sm:$0xff]  ;;  %v104_v39 = vld [vmem:[#allocation6 + $0x110] sm:$0xff]  ;;  %v87_v40 = vld [vmem:[#allocation6 + $0x88] sm:$0xff]  ;;  %v2327_v42 = vpack.c.bf16 %v97_v35, %v94_v32 }
  0x41   :  { %2344 = vmatpush3.bf16.msra.mxu1 %v2341_v28  ;;  %2017 = vmatprep.mubr.f32.mxu1 %v3122_v36  ;;  %v2349_v41 = vpack.c.bf16 %v87_v40, %v84_v37  ;;  %v90_v43 = vld [vmem:[#allocation6 + $0xa0] sm:$0xff]  ;;  %v93_v44 = vld [vmem:[#allocation6 + $0xb8] sm:$0xff]  ;;  %v2329_v45 = vpack.c.bf16 %v104_v39, %v101_v38  ;;  %v100_v46 = vld [vmem:[#allocation6 + $0xf0] sm:$0xff]  ;;  %v3046_v40 = vmov 0.0|0.0  }
  0x42   :  { %2346 = vmatprep.subr.bf16.mxu1 %v2345_v33  ;;  %v103_v47 = vld [vmem:[#allocation6 + $0x108] sm:$0xff]  ;;  %v110_v49 = vld [vmem:[#allocation6 + $0x140] sm:$0xff]  ;;  %v2353_v50 = vpack.c.bf16 %v93_v44, %v90_v43  ;;  %v96_v51 = vld [vmem:[#allocation6 + $0xd0] sm:$0xff] }
  0x43   :  { %2320 = vmatpush1.bf16.msra.mxu0 %v2319_v20  ;;  %v107_v48 = vld [vmem:[#allocation6 + $0x128] sm:$0xff]  ;;  %v2331_v53 = vpack.c.bf16 %v103_v47, %v100_v46  ;;  %v106_v55 = vld [vmem:[#allocation6 + $0x120] sm:$0xff]  ;;  %v109_v56 = vld [vmem:[#allocation6 + $0x138] sm:$0xff] }
  0x44   :  { %2322 = vmatprep.subr.bf16.mxu0 %v2321_v22  ;;  %v99_v52 = vld [vmem:[#allocation6 + $0xe8] sm:$0xff]  ;;  %v2333_v54 = vpack.c.bf16 %v110_v49, %v107_v48  ;;  %v113_v57 = vld [vmem:[#allocation6 + $0x158] sm:$0xff]  ;;  %v116_v58 = vld [vmem:[#allocation6 + $0x170] sm:$0xff]  ;;  %v2335_v62 = vpack.c.bf16 %v109_v56, %v106_v55 }
  0x45   :  { %2348 = vmatpush3.bf16.msra.mxu1 %v2345_v33  ;;  %v2357_v59 = vpack.c.bf16 %v99_v52, %v96_v51  ;;  %v102_v60 = vld [vmem:[#allocation6 + $0x100] sm:$0xff]  ;;  %v105_v61 = vld [vmem:[#allocation6 + $0x118] sm:$0xff]  ;;  %v2337_v63 = vpack.c.bf16 %v116_v58, %v113_v57  ;;  %v112_v1 = vld [vmem:[#allocation6 + $0x150] sm:$0xff] }
  0x46   :  { %2350 = vmatprep.subr.bf16.mxu1 %v2349_v41  ;;  %v115_v2 = vld [vmem:[#allocation6 + $0x168] sm:$0xff]  ;;  %v381_v4 = vld [vmem:[#allocation8 + $0x20] sm:$0xff]  ;;  %v2361_v5 = vpack.c.bf16 %v105_v61, %v102_v60  ;;  %v108_v6 = vld [vmem:[#allocation6 + $0x130] sm:$0xff] }
  0x47   :  { %2324 = vmatpush1.bf16.msra.mxu0 %v2323_v31  ;;  %v378_v3 = vld [vmem:[#allocation8 + $0x8] sm:$0xff]  ;;  %v2339_v8 = vpack.c.bf16 %v115_v2, %v112_v1  ;;  %v377_v10 = vld [vmem:[#allocation8] sm:$0xff]  ;;  %v380_v11 = vld [vmem:[#allocation8 + $0x18] sm:$0xff] }
  0x48   :  { %2326 = vmatprep.subr.bf16.mxu0 %v2325_v34  ;;  %v111_v7 = vld [vmem:[#allocation6 + $0x148] sm:$0xff]  ;;  %v3125_v9 = vpack.c.bf16 %v381_v4, %v378_v3  ;;  %v384_v12 = vld [vmem:[#allocation8 + $0x38] sm:$0xff]  ;;  %v387_v13 = vld [vmem:[#allocation8 + $0x50] sm:$0xff]  ;;  %v3127_v17 = vpack.c.bf16 %v380_v11, %v377_v10 }
  0x49   :  { %2352 = vmatpush3.bf16.msra.mxu1 %v2349_v41  ;;  %v2365_v14 = vpack.c.bf16 %v111_v7, %v108_v6  ;;  %v114_v15 = vld [vmem:[#allocation6 + $0x160] sm:$0xff]  ;;  %v117_v16 = vld [vmem:[#allocation6 + $0x178] sm:$0xff]  ;;  %v3130_v18 = vpack.c.bf16 %v387_v13, %v384_v12  ;;  %v383_v19 = vld [vmem:[#allocation8 + $0x30] sm:$0xff] }
  0x4a   :  { %2354 = vmatprep.subr.bf16.mxu1 %v2353_v50  ;;  %v386_v20 = vld [vmem:[#allocation8 + $0x48] sm:$0xff]  ;;  %v393_v22 = vld [vmem:[#allocation8 + $0x80] sm:$0xff]  ;;  %v2369_v23 = vpack.c.bf16 %v117_v16, %v114_v15  ;;  %v392_v28 = vld [vmem:[#allocation8 + $0x78] sm:$0xff] }
  0x4b   :  { %2328 = vmatpush1.bf16.msra.mxu0 %v2327_v42  ;;  %v390_v21 = vld [vmem:[#allocation8 + $0x68] sm:$0xff]  ;;  %v3135_v25 = vpack.c.bf16 %v386_v20, %v383_v19  ;;  %v389_v27 = vld [vmem:[#allocation8 + $0x60] sm:$0xff]  ;;  %v396_v29 = vld [vmem:[#allocation8 + $0x98] sm:$0xff] }
  0x4c   :  { %2330 = vmatprep.subr.bf16.mxu0 %v2329_v45  ;;  %v63_v24 = vld [vmem:[#allocation3 + $0x8] sm:$0xff]  ;;  %v3138_v26 = vpack.c.bf16 %v393_v22, %v390_v21  ;;  %v399_v30 = vld [vmem:[#allocation8 + $0xb0] sm:$0xff]  ;;  %v3142_v34 = vpack.c.bf16 %v392_v28, %v389_v27  ;;  %v405_v39 = vld [vmem:[#allocation8 + $0xe0] sm:$0xff] }
  0x4d   :  { %2356 = vmatpush3.bf16.msra.mxu1 %v2353_v50  ;;  %v379_v31 = vld [vmem:[#allocation8 + $0x10] sm:$0xff]  ;;  %v382_v32 = vld [vmem:[#allocation8 + $0x28] sm:$0xff]  ;;  %v3145_v35 = vpack.c.bf16 %v399_v30, %v396_v29  ;;  %v385_v42 = vld [vmem:[#allocation8 + $0x40] sm:$0xff] }
  0x4e   :  { %2358 = vmatprep.subr.bf16.mxu1 %v2357_v59  ;;  %v64_v33 = vld [vmem:[#allocation3 + $0x10] sm:$0xff]  ;;  %v398_v37 = vld [vmem:[#allocation8 + $0xa8] sm:$0xff]  ;;  %v3148_v41 = vpack.c.bf16 %v382_v32, %v379_v31  ;;  %v388_v43 = vld [vmem:[#allocation8 + $0x58] sm:$0xff] }
  0x4f   :  { %2332 = vmatpush1.bf16.msra.mxu0 %v2331_v53  ;;  %v402_v38 = vld [vmem:[#allocation8 + $0xc8] sm:$0xff]  ;;  %v65_v44 = vld [vmem:[#allocation3 + $0x18] sm:$0xff]  ;;  %v401_v47 = vld [vmem:[#allocation8 + $0xc0] sm:$0xff]  ;;  %v3158_v51 = vpack.c.bf16 %v388_v43, %v385_v42 }
  0x50   :  { %2334 = vmatprep.subr.bf16.mxu0 %v2333_v54  ;;  %v3155_v46 = vpack.c.bf16 %v405_v39, %v402_v38  ;;  %v404_v48 = vld [vmem:[#allocation8 + $0xd8] sm:$0xff]  ;;  %v411_v50 = vld [vmem:[#allocation8 + $0x110] sm:$0xff]  ;;  %v394_v53 = vld [vmem:[#allocation8 + $0x88] sm:$0xff] }
  0x51   :  { %2360 = vmatpush3.bf16.msra.mxu1 %v2357_v59  ;;  %v408_v49 = vld [vmem:[#allocation8 + $0xf8] sm:$0xff]  ;;  %v391_v52 = vld [vmem:[#allocation8 + $0x70] sm:$0xff]  ;;  %v66_v54 = vld [vmem:[#allocation3 + $0x20] sm:$0xff]  ;;  %v3163_v55 = vpack.c.bf16 %v404_v48, %v401_v47 }
  0x52   :  { %2362 = vmatprep.subr.bf16.mxu1 %v2361_v5  ;;  %v3166_v56 = vpack.c.bf16 %v411_v50, %v408_v49  ;;  %v407_v57 = vld [vmem:[#allocation8 + $0xf0] sm:$0xff]  ;;  %v410_v58 = vld [vmem:[#allocation8 + $0x108] sm:$0xff]  ;;  %v417_v60 = vld [vmem:[#allocation8 + $0x140] sm:$0xff]  ;;  %v3169_v61 = vpack.c.bf16 %v394_v53, %v391_v52 }
  0x53   :  { %2336 = vmatpush1.bf16.msra.mxu0 %v2335_v62  ;;  %v414_v59 = vld [vmem:[#allocation8 + $0x128] sm:$0xff]  ;;  %v397_v62 = vld [vmem:[#allocation8 + $0xa0] sm:$0xff]  ;;  %v3174_v2 = vpack.c.bf16 %v410_v58, %v407_v57  ;;  %v68_v3 = vld [vmem:[#allocation3 + $0x30] sm:$0xff] }
  0x54   :  { %2338 = vmatprep.subr.bf16.mxu0 %v2337_v63  ;;  %v400_v63 = vld [vmem:[#allocation8 + $0xb8] sm:$0xff]  ;;  %v67_v1 = vld [vmem:[#allocation3 + $0x28] sm:$0xff]  ;;  %v3177_v4 = vpack.c.bf16 %v417_v60, %v414_v59  ;;  %v403_v11 = vld [vmem:[#allocation8 + $0xd0] sm:$0xff] }
  0x55   :  { %2364 = vmatpush3.bf16.msra.mxu1 %v2361_v5  ;;  %v413_v5 = vld [vmem:[#allocation8 + $0x120] sm:$0xff]  ;;  %v416_v6 = vld [vmem:[#allocation8 + $0x138] sm:$0xff]  ;;  %v3180_v10 = vpack.c.bf16 %v400_v63, %v397_v62  ;;  %v406_v12 = vld [vmem:[#allocation8 + $0xe8] sm:$0xff] }
  0x56   :  { %2366 = vmatprep.subr.bf16.mxu1 %v2365_v14  ;;  %v420_v7 = vld [vmem:[#allocation8 + $0x158] sm:$0xff]  ;;  %v3185_v13 = vpack.c.bf16 %v416_v6, %v413_v5  ;;  %v419_v16 = vld [vmem:[#allocation8 + $0x150] sm:$0xff]  ;;  %v422_v19 = vld [vmem:[#allocation8 + $0x168] sm:$0xff]  ;;  %v3191_v20 = vpack.c.bf16 %v406_v12, %v403_v11 }
  0x57   :  { %2340 = vmatpush1.bf16.msra.mxu0 %v2339_v8  ;;  %v423_v8 = vld [vmem:[#allocation8 + $0x170] sm:$0xff]  ;;  %v409_v21 = vld [vmem:[#allocation8 + $0x100] sm:$0xff]  ;;  %v412_v22 = vld [vmem:[#allocation8 + $0x118] sm:$0xff] }
  0x58   :  { %2374 = vmatprep.subr.bf16.mxu0 %v3125_v9  ;;  %v3188_v15 = vpack.c.bf16 %v423_v8, %v420_v7  ;;  %v415_v27 = vld [vmem:[#allocation8 + $0x130] sm:$0xff]  ;;  %v418_v28 = vld [vmem:[#allocation8 + $0x148] sm:$0xff]  ;;  %v421_v30 = vld [vmem:[#allocation8 + $0x160] sm:$0xff] }
  0x59   :  { %2368 = vmatpush3.bf16.msra.mxu1 %v2365_v14  ;;  %v69_v14 = vld [vmem:[#allocation3 + $0x38] sm:$0xff]  ;;  %v3209_v29 = vpack.c.bf16 %v418_v28, %v415_v27  ;;  %v118_v38 = vld [vmem:[%s3535_s3] sm:$0x7] }
  0x5a   :  { %200 = vmatmul.mubr.f32.vlgmr.msra.gmra.mrb[0].mxu0 %v3122_v36  ;;  %2370 = vmatprep.subr.bf16.mxu1 %v2369_v23  ;;  %v395_v36 = vld [vmem:[#allocation8 + $0x90] sm:$0xff]  ;;  %v424_v31 = vld [vmem:[#allocation8 + $0x178] sm:$0xff]  ;;  %v3281_v28 = vld [vmem:[%s3536_s4] ss:$0 sm:$0xff]  ;;  %s3048_s4 = smov [#allocation9]  }
  0x5b   :  { %2376 = vmatpush1.bf16.msra.mxu0 %v3127_v17  ;;  %205 = vmatprep.mubr.f32.mxu0 %v3045_v0  ;;  %v3152_v45 = vpack.c.bf16 %v398_v37, %v395_v36  ;;  %v3217_v32 = vpack.c.bf16 %v424_v31, %v421_v30  ;;  %s1791_s8 = sshll.u32 %s3048_s4, 4  ;;  %s1792_s8 = int_to_ptr.vmem [resolvable:$true] %s1791_s8 }
  0x5c   :  { %2378 = vmatprep.subr.bf16.mxu0 %v3130_v18  ;;  %s3010_s9 = scalar_lea.vmem %s1792_s8, 128  ;;  %p3015_p11 = scmp.lt.s32.totalorder %s1792_s8, %s1792_s8 }
  0x5d   :  { %2372 = vmatpush3.bf16.msra.mxu1 %v2369_v23  ;;  %v3198_v23 = vpack.c.bf16 %v422_v19, %v419_v16  ;;  %p3011_p10 = scmp.ne.s32.totalorder %s1792_s8, %s3010_s9  ;;  %p3016_p12 = scmp.lt.s32.totalorder %s3010_s9, %s3010_s9 }
  0x5e   :  { %206 = vmatmul.mubr.f32.gmra.mrb[2].mxu0 %v63_v24  ;;  %2405 = vmatprep.subr.bf16.mxu1 %v3046_v40 }
  0x5f   :  { %2380 = vmatpush1.bf16.msra.mxu0 %v3135_v25  ;;  %211 = vmatprep.mubr.f32.mxu0 %v3045_v0  ;;  %p3017_p13 = por %p3016_p12, %p3015_p11 }
  0x60   :  { %2382 = vmatprep.subr.bf16.mxu0 %v3138_v26  ;;  %2018 = vmatmul.mubr.f32.vlgmr.msra.gmra.mrb[0].mxu1 %v63_v24  ;;  %v3202_v24 = vpack.c.bf16 %v412_v22, %v409_v21 }
  0x61   :  { %2407 = vmatpush3.bf16.msra.mxu1 %v3148_v41  ;;  %2020 = vmatprep.mubr.f32.mxu1 %v64_v33  ;;  %p3018_p0 = pnand %p3017_p13, %p3011_p10 }
  0x62   :  { %212 = vmatmul.mubr.f32.gmra.mrb[4].mxu0 %v64_v33  ;;  %2408 = vmatprep.subr.bf16.mxu1 %v3046_v40  ;;  %v120_v33 = vlaneseq }
  0x63   :  { %2384 = vmatpush1.bf16.msra.mxu0 %v3142_v34  ;;  %217 = vmatprep.mubr.f32.mxu0 %v3045_v0 }
  0x64   :  { %2386 = vmatprep.subr.bf16.mxu0 %v3145_v35  ;;  %2021 = vmatmul.mubr.f32.gmra.mrb[2].mxu1 %v65_v44  ;;  %v121_v36 = vshrl.u32 %v120_v33, 7 }
  0x65   :  { %2410 = vmatpush3.bf16.msra.mxu1 %v3158_v51  ;;  %2023 = vmatprep.mubr.f32.mxu1 %v66_v54 }
  0x66   :  { %218 = vmatmul.mubr.f32.gmra.mrb[6].mxu0 %v65_v44  ;;  %2411 = vmatprep.subr.bf16.mxu1 %v3046_v40  ;;  %v130_v37 = vsub.s32 2, %v121_v36  ;;  %v122_v63 = vsub.s32 0, %v121_v36 }
  0x67   :  { %2388 = vmatpush1.bf16.msra.mxu0 %v3152_v45  ;;  %223 = vmatprep.mubr.f32.mxu0 %v3045_v0 }
  0x68   :  { %2390 = vmatprep.subr.bf16.mxu0 %v3155_v46  ;;  %2024 = vmatmul.mubr.f32.gmra.mrb[4].mxu1 %v67_v1  ;;  %v131_v39 = vrot.slane %v118_v38, %v130_v37 }
  0x69   :  { %2413 = vmatpush3.bf16.msra.mxu1 %v3169_v61  ;;  %2026 = vmatprep.mubr.f32.mxu1 %v68_v3 }
  0x6a   :  { %224 = vmatmul.mubr.f32.gmra.mrb[8].mxu0 %v66_v54  ;;  %2414 = vmatprep.subr.bf16.mxu1 %v3046_v40 }
  0x6b   :  { %2392 = vmatpush1.bf16.msra.mxu0 %v3163_v55  ;;  %229 = vmatprep.mubr.f32.mxu0 %v3045_v0 }
  0x6c   :  { %2394 = vmatprep.subr.bf16.mxu0 %v3166_v56  ;;  %2027 = vmatmul.mubr.f32.gmra.mrb[6].mxu1 %v69_v14 }
  0x6d   :  { %2416 = vmatpush3.bf16.msra.mxu1 %v3180_v10  ;;  %2061 = vmatprep.mubr.msk.f32.mxu1 %vm3047_vm0, %v3045_v0 }
  0x6e   :  { %230 = vmatmul.mubr.f32.gmra.mrb[10].mxu0 %v67_v1  ;;  %2417 = vmatprep.subr.bf16.mxu1 %v3046_v40  ;;  %v126_v1 = vsub.s32 1, %v121_v36 }
  0x6f   :  { %2396 = vmatpush1.bf16.msra.mxu0 %v3174_v2  ;;  %235 = vmatprep.mubr.f32.mxu0 %v3045_v0 }
  0x70   :  { %2398 = vmatprep.subr.bf16.mxu0 %v3177_v4  ;;  %v3274_v6 = vrot.slane %v118_v38, %v126_v1 }
  0x71   :  { %2419 = vmatpush3.bf16.msra.mxu1 %v3191_v20 }
  0x72   :  { %236 = vmatmul.mubr.f32.gmra.mrb[12].mxu0 %v68_v3  ;;  %2420 = vmatprep.subr.bf16.mxu1 %v3046_v40  ;;  %v3272_v3 = vrot.slane %v118_v38, %v122_v63 }
  0x73   :  { %2400 = vmatpush1.bf16.msra.mxu0 %v3185_v13  ;;  %241 = vmatprep.mubr.f32.mxu0 %v3045_v0 }
  0x74   :  { %2402 = vmatprep.subr.bf16.mxu0 %v3188_v15 }
  0x75   :  { %2422 = vmatpush3.bf16.msra.mxu1 %v3202_v24 }
  0x76   :  { %242 = vmatmul.mubr.f32.gmra.mrb[14].mxu0 %v69_v14  ;;  %2423 = vmatprep.subr.bf16.mxu1 %v3046_v40 }
  0x77   :  { %2404 = vmatpush1.bf16.msra.mxu0 %v3198_v23  ;;  %496 = vmatprep.mubr.f32.mxu0 %v3045_v0 }
  0x78   :  { %2430 = vmatprep.subr.bf16.mxu0 %v3125_v9 }
  0x79   :  { %2425 = vmatpush3.bf16.msra.mxu1 %v3209_v29 }
  0x7a   :  { %497 = vmatmul.mubr.f32.vlgmr.msra.gmra.mrb[0].mxu0 %v3045_v0  ;;  %2426 = vmatprep.subr.bf16.mxu1 %v3046_v40 }
  0x7b   :  { %2432 = vmatpush1.bf16.msra.mxu0 %v3127_v17  ;;  %671 = vmatprep.mubr.f32.mxu0 %v3045_v0 }
  0x7c   :  { %2434 = vmatprep.subr.bf16.mxu0 %v3130_v18 }
  0x7d   :  { %2428 = vmatpush3.bf16.msra.mxu1 %v3217_v32 }
  0x7e   :  { %2461 = vmatprep.subr.bf16.mxu1 %v3046_v40 }
  0x7f   :  { %2436 = vmatpush1.bf16.msra.mxu0 %v3135_v25 }
  0x80   :  { %2438 = vmatprep.subr.bf16.mxu0 %v3138_v26  ;;  %2062 = vmatmul.mubr.f32.vlgmr.msra.gmra.mrb[8].mxu1 %v3045_v0 }
  0x81   :  { %2463 = vmatpush3.bf16.msra.mxu1 %v3148_v41  ;;  %2096 = vmatprep.mubr.msk.f32.mxu1 %vm3047_vm0, %v3045_v0 }
  0x82   :  { %2464 = vmatprep.subr.bf16.mxu1 %v3046_v40 }
  0x83   :  { %2440 = vmatpush1.bf16.msra.mxu0 %v3142_v34 }
  0x84   :  { %2442 = vmatprep.subr.bf16.mxu0 %v3145_v35 }
  0x85   :  { %2466 = vmatpush3.bf16.msra.mxu1 %v3158_v51 }
  0x86   :  { %2467 = vmatprep.subr.bf16.mxu1 %v3046_v40 }
  0x87   :  { %2444 = vmatpush1.bf16.msra.mxu0 %v3152_v45 }
  0x88   :  { %2446 = vmatprep.subr.bf16.mxu0 %v3155_v46 }
  0x89   :  { %2469 = vmatpush3.bf16.msra.mxu1 %v3169_v61 }
  0x8a   :  { %2470 = vmatprep.subr.bf16.mxu1 %v3046_v40 }
  0x8b   :  { %2448 = vmatpush1.bf16.msra.mxu0 %v3163_v55 }
  0x8c   :  { %2450 = vmatprep.subr.bf16.mxu0 %v3166_v56 }
  0x8d   :  { %2472 = vmatpush3.bf16.msra.mxu1 %v3180_v10 }
  0x8e   :  { %2473 = vmatprep.subr.bf16.mxu1 %v3046_v40 }
  0x8f   :  { %2452 = vmatpush1.bf16.msra.mxu0 %v3174_v2 }
  0x90   :  { %2454 = vmatprep.subr.bf16.mxu0 %v3177_v4 }
  0x91   :  { %2475 = vmatpush3.bf16.msra.mxu1 %v3191_v20 }
  0x92   :  { %2476 = vmatprep.subr.bf16.mxu1 %v3046_v40 }
  0x93   :  { %2456 = vmatpush1.bf16.msra.mxu0 %v3185_v13 }
  0x94   :  { %2458 = vmatprep.subr.bf16.mxu0 %v3188_v15 }
  0x95   :  { %2478 = vmatpush3.bf16.msra.mxu1 %v3202_v24 }
  0x96   :  { %2479 = vmatprep.subr.bf16.mxu1 %v3046_v40 }
  0x97   :  { %2460 = vmatpush1.bf16.msra.mxu0 %v3198_v23 }
  0x98   :  { %2486 = vmatprep.subr.bf16.mxu0 %v3125_v9 }
  0x99   :  { %2481 = vmatpush3.bf16.msra.mxu1 %v3209_v29 }
  0x9a   :  { %2482 = vmatprep.subr.bf16.mxu1 %v3046_v40 }
  0x9d   :  { %2484 = vmatpush3.bf16.msra.mxu1 %v3217_v32 }
  0x9e   :  { %2517 = vmatprep.subr.bf16.mxu1 %v3046_v40 }
 0x133   :  { %v2019_v42 = vpop.f32.mrb[0].mxu1 }
 0x134   :  { %v3258_v43 = vadd.f32 %v2019_v42, %v131_v39  ;;  %v314_v44 = vpop.f32.mrb[1].mxu1 }
 0x135   :  { %v315_v36 = vadd.f32 %v314_v44, %v131_v39 }
 0x137   :  { %v2022_v47 = vpop.f32.mrb[2].mxu1 }
 0x138   :  { %v3260_v48 = vadd.f32 %v2022_v47, %v131_v39  ;;  %v324_v49 = vpop.f32.mrb[3].mxu1 }
 0x139   :  { %v3262_v50 = vadd.f32 %v324_v49, %v131_v39 }
 0x13b   :  { %v2025_v52 = vpop.f32.mrb[4].mxu1 }
 0x13c   :  { %v3264_v53 = vadd.f32 %v2025_v52, %v131_v39  ;;  %v334_v54 = vpop.f32.mrb[5].mxu1 }
 0x13d   :  { %v3266_v57 = vadd.f32 %v334_v54, %v131_v39 }
 0x13f   :  { %v2028_v58 = vpop.f32.mrb[6].mxu1 }
 0x140   :  { %v3268_v59 = vadd.f32 %v2028_v58, %v131_v39  ;;  %v344_v60 = vpop.f32.mrb[7].mxu1 }
 0x141   :  { %v3270_v62 = vadd.f32 %v344_v60, %v131_v39 }
 0x14d   :  { %v498_v5 = vpop.f32.mrb[0].mxu0 }
 0x14e   :  { %v2821_v7 = vadd.f32 %v498_v5, %v3272_v3  ;;  %v500_v8 = vpop.f32.mrb[1].mxu0 }
 0x14f   :  { %v2822_v12 = vadd.f32 %v500_v8, %v3274_v6 }
 0x150   :  { %v1808_v11 = vmul.f32 -1.442695, %v2821_v7 }
 0x151   :  { %v1809_v14 = vmul.f32 -1.442695, %v2822_v12 }
 0x152   :  { %2864 = vpow2.f32 %v1808_v11 }
 0x153   :  { %v569_v16 = vpop.f32.mrb[8].mxu1  ;;  %2866 = vpow2.f32 %v1809_v14 }
 0x154   :  { %v2063_v19 = vpop.f32.mrb[9].mxu1  ;;  %v593_v31 = vadd.f32 %v3281_v28, %v569_v16 }
 0x15c   :  { %v2865_v21 = vpop.eup %2864 }
 0x15d   :  { %v577_v22 = vadd.f32 1.0, %v2865_v21  ;;  %v2867_v27 = vpop.eup %2866 }
 0x15e   :  { %v584_v30 = vadd.f32 1.0, %v2867_v27 }
 0x15f   :  { %2868 = vrcp.f32 %v577_v22 }
 0x160   :  { %2870 = vrcp.f32 %v584_v30 }
 0x169   :  { %v2869_v33 = vpop.eup %2868 }
 0x16a   :  { %v594_v37 = vmul.f32 %v2869_v33, %v593_v31  ;;  %v2871_v42 = vpop.eup %2870 }
 0x16b   :  { %v597_v47 = vsub.f32 1.0, %v2871_v42  ;;  %v599_v54 = vmul.f32 0.0, %v2871_v42 }
 0x16c   :  { %v595_v38 = vadd.f32 %v594_v37, %v315_v36 }
 0x16e   :  { %2872 = vtanh.f32 %v595_v38 }
 0x178   :  { %v2873_v49 = vpop.eup %2872 }
 0x179   :  { %v598_v52 = vmul.f32 %v2873_v49, %v597_v47 }
 0x17b   :  { %v600_v58 = vadd.f32 %v599_v54, %v598_v52 }
 0x17d   :  { %672 = vmatmul.mubr.f32.vlgmr.msra.gmra.mrb[2].mxu0 %v600_v58  ;;  %2097 = vmatmul.mubr.f32.vlgmr.msra.gmra.mrb[10].mxu1 %v600_v58 }
 0x17e   :  { %2488 = vmatpush1.bf16.msra.mxu0 %v3127_v17  ;;  %2519 = vmatpush3.bf16.msra.mxu1 %v3148_v41 }
 0x17f   :  { %2490 = vmatprep.subr.bf16.mxu0 %v3130_v18  ;;  %2520 = vmatprep.subr.bf16.mxu1 %v3046_v40 }
 0x180   :  { %840 = vmatprep.mubr.f32.mxu0 %v3045_v0  ;;  %2131 = vmatprep.mubr.msk.f32.mxu1 %vm3047_vm0, %v3045_v0 }
 0x182   :  { %2492 = vmatpush1.bf16.msra.mxu0 %v3135_v25  ;;  %2522 = vmatpush3.bf16.msra.mxu1 %v3158_v51 }
 0x183   :  { %2494 = vmatprep.subr.bf16.mxu0 %v3138_v26  ;;  %2523 = vmatprep.subr.bf16.mxu1 %v3046_v40 }
 0x186   :  { %2496 = vmatpush1.bf16.msra.mxu0 %v3142_v34  ;;  %2525 = vmatpush3.bf16.msra.mxu1 %v3169_v61 }
 0x187   :  { %2498 = vmatprep.subr.bf16.mxu0 %v3145_v35  ;;  %2526 = vmatprep.subr.bf16.mxu1 %v3046_v40 }
 0x18a   :  { %2500 = vmatpush1.bf16.msra.mxu0 %v3152_v45  ;;  %2528 = vmatpush3.bf16.msra.mxu1 %v3180_v10 }
 0x18b   :  { %2502 = vmatprep.subr.bf16.mxu0 %v3155_v46  ;;  %2529 = vmatprep.subr.bf16.mxu1 %v3046_v40 }
 0x18e   :  { %2504 = vmatpush1.bf16.msra.mxu0 %v3163_v55  ;;  %2531 = vmatpush3.bf16.msra.mxu1 %v3191_v20 }
 0x18f   :  { %2506 = vmatprep.subr.bf16.mxu0 %v3166_v56  ;;  %2532 = vmatprep.subr.bf16.mxu1 %v3046_v40 }
 0x192   :  { %2508 = vmatpush1.bf16.msra.mxu0 %v3174_v2  ;;  %2534 = vmatpush3.bf16.msra.mxu1 %v3202_v24 }
 0x193   :  { %2510 = vmatprep.subr.bf16.mxu0 %v3177_v4  ;;  %2535 = vmatprep.subr.bf16.mxu1 %v3046_v40 }
 0x196   :  { %2512 = vmatpush1.bf16.msra.mxu0 %v3185_v13  ;;  %2537 = vmatpush3.bf16.msra.mxu1 %v3209_v29 }
 0x197   :  { %2514 = vmatprep.subr.bf16.mxu0 %v3188_v15  ;;  %2538 = vmatprep.subr.bf16.mxu1 %v3046_v40 }
 0x19a   :  { %2516 = vmatpush1.bf16.msra.mxu0 %v3198_v23  ;;  %2540 = vmatpush3.bf16.msra.mxu1 %v3217_v32 }
 0x19b   :  { %2542 = vmatprep.subr.bf16.mxu0 %v3125_v9  ;;  %2573 = vmatprep.subr.bf16.mxu1 %v3046_v40 }
 0x250   :  { %v673_v39 = vpop.f32.mrb[2].mxu0  ;;  %v744_v44 = vpop.f32.mrb[10].mxu1 }
 0x251   :  { %v2823_v60 = vadd.f32 %v673_v39, %v3272_v3  ;;  %v675_v63 = vpop.f32.mrb[3].mxu0  ;;  %v2098_v1 = vpop.f32.mrb[11].mxu1  ;;  %v762_v19 = vadd.f32 %v3281_v28, %v744_v44 }
 0x252   :  { %v2824_v7 = vadd.f32 %v675_v63, %v3274_v6 }
 0x253   :  { %v1811_v5 = vmul.f32 -1.442695, %v2823_v60 }
 0x254   :  { %v1812_v8 = vmul.f32 -1.442695, %v2824_v7 }
 0x255   :  { %2874 = vpow2.f32 %v1811_v5 }
 0x256   :  { %2876 = vpow2.f32 %v1812_v8 }
 0x25f   :  { %v2875_v11 = vpop.eup %2874 }
 0x260   :  { %v752_v12 = vadd.f32 1.0, %v2875_v11  ;;  %v2877_v14 = vpop.eup %2876 }
 0x261   :  { %v759_v16 = vadd.f32 1.0, %v2877_v14 }
 0x262   :  { %2878 = vrcp.f32 %v752_v12 }
 0x263   :  { %2880 = vrcp.f32 %v759_v16 }
 0x26c   :  { %v2879_v21 = vpop.eup %2878 }
 0x26d   :  { %v763_v22 = vmul.f32 %v2879_v21, %v762_v19  ;;  %v2881_v30 = vpop.eup %2880 }
 0x26e   :  { %v766_v31 = vsub.f32 1.0, %v2881_v30  ;;  %v768_v37 = vmul.f32 %v2881_v30, %v600_v58 }
 0x26f   :  { %v764_v27 = vadd.f32 %v763_v22, %v3258_v43 }
 0x271   :  { %2882 = vtanh.f32 %v764_v27 }
 0x27b   :  { %v2883_v33 = vpop.eup %2882 }
 0x27c   :  { %v767_v36 = vmul.f32 %v2883_v33, %v766_v31 }
 0x27e   :  { %v769_v38 = vadd.f32 %v768_v37, %v767_v36 }
 0x280   :  { %841 = vmatmul.mubr.f32.vlgmr.msra.gmra.mrb[4].mxu0 %v769_v38  ;;  %2132 = vmatmul.mubr.f32.vlgmr.msra.gmra.mrb[12].mxu1 %v769_v38 }
 0x281   :  { %2544 = vmatpush1.bf16.msra.mxu0 %v3127_v17  ;;  %2575 = vmatpush3.bf16.msra.mxu1 %v3148_v41 }
 0x282   :  { %2546 = vmatprep.subr.bf16.mxu0 %v3130_v18  ;;  %2576 = vmatprep.subr.bf16.mxu1 %v3046_v40 }
 0x283   :  { %1009 = vmatprep.mubr.f32.mxu0 %v3045_v0  ;;  %2166 = vmatprep.mubr.msk.f32.mxu1 %vm3047_vm0, %v3045_v0 }
 0x285   :  { %2548 = vmatpush1.bf16.msra.mxu0 %v3135_v25  ;;  %2578 = vmatpush3.bf16.msra.mxu1 %v3158_v51 }
 0x286   :  { %2550 = vmatprep.subr.bf16.mxu0 %v3138_v26  ;;  %2579 = vmatprep.subr.bf16.mxu1 %v3046_v40 }
 0x289   :  { %2552 = vmatpush1.bf16.msra.mxu0 %v3142_v34  ;;  %2581 = vmatpush3.bf16.msra.mxu1 %v3169_v61 }
 0x28a   :  { %2554 = vmatprep.subr.bf16.mxu0 %v3145_v35  ;;  %2582 = vmatprep.subr.bf16.mxu1 %v3046_v40 }
 0x28d   :  { %2556 = vmatpush1.bf16.msra.mxu0 %v3152_v45  ;;  %2584 = vmatpush3.bf16.msra.mxu1 %v3180_v10 }
 0x28e   :  { %2558 = vmatprep.subr.bf16.mxu0 %v3155_v46  ;;  %2585 = vmatprep.subr.bf16.mxu1 %v3046_v40 }
 0x291   :  { %2560 = vmatpush1.bf16.msra.mxu0 %v3163_v55  ;;  %2587 = vmatpush3.bf16.msra.mxu1 %v3191_v20 }
 0x292   :  { %2562 = vmatprep.subr.bf16.mxu0 %v3166_v56  ;;  %2588 = vmatprep.subr.bf16.mxu1 %v3046_v40 }
 0x295   :  { %2564 = vmatpush1.bf16.msra.mxu0 %v3174_v2  ;;  %2590 = vmatpush3.bf16.msra.mxu1 %v3202_v24 }
 0x296   :  { %2566 = vmatprep.subr.bf16.mxu0 %v3177_v4  ;;  %2591 = vmatprep.subr.bf16.mxu1 %v3046_v40 }
 0x299   :  { %2568 = vmatpush1.bf16.msra.mxu0 %v3185_v13  ;;  %2593 = vmatpush3.bf16.msra.mxu1 %v3209_v29 }
 0x29a   :  { %2570 = vmatprep.subr.bf16.mxu0 %v3188_v15  ;;  %2594 = vmatprep.subr.bf16.mxu1 %v3046_v40 }
 0x29d   :  { %2572 = vmatpush1.bf16.msra.mxu0 %v3198_v23  ;;  %2596 = vmatpush3.bf16.msra.mxu1 %v3217_v32 }
 0x29e   :  { %2598 = vmatprep.subr.bf16.mxu0 %v3125_v9  ;;  %2629 = vmatprep.subr.bf16.mxu1 %v3046_v40 }
 0x353   :  { %v842_v43 = vpop.f32.mrb[4].mxu0  ;;  %v913_v42 = vpop.f32.mrb[12].mxu1 }
 0x354   :  { %v2825_v47 = vadd.f32 %v842_v43, %v3272_v3  ;;  %v844_v49 = vpop.f32.mrb[5].mxu0  ;;  %v2133_v52 = vpop.f32.mrb[13].mxu1  ;;  %v931_v5 = vadd.f32 %v3281_v28, %v913_v42 }
 0x355   :  { %v2826_v58 = vadd.f32 %v844_v49, %v3274_v6 }
 0x356   :  { %v1813_v54 = vmul.f32 -1.442695, %v2825_v47 }
 0x357   :  { %v1814_v39 = vmul.f32 -1.442695, %v2826_v58 }
 0x358   :  { %2884 = vpow2.f32 %v1813_v54 }
 0x359   :  { %2886 = vpow2.f32 %v1814_v39 }
 0x362   :  { %v2885_v44 = vpop.eup %2884 }
 0x363   :  { %v921_v60 = vadd.f32 1.0, %v2885_v44  ;;  %v2887_v63 = vpop.eup %2886 }
 0x364   :  { %v928_v1 = vadd.f32 1.0, %v2887_v63 }
 0x365   :  { %2888 = vrcp.f32 %v921_v60 }
 0x366   :  { %2890 = vrcp.f32 %v928_v1 }
 0x36f   :  { %v2889_v7 = vpop.eup %2888 }
 0x370   :  { %v932_v8 = vmul.f32 %v2889_v7, %v931_v5  ;;  %v2891_v12 = vpop.eup %2890 }
 0x371   :  { %v935_v14 = vsub.f32 1.0, %v2891_v12  ;;  %v937_v21 = vmul.f32 %v2891_v12, %v769_v38 }
 0x372   :  { %v933_v11 = vadd.f32 %v932_v8, %v3262_v50 }
 0x374   :  { %2892 = vtanh.f32 %v933_v11 }
 0x37e   :  { %v2893_v16 = vpop.eup %2892 }
 0x37f   :  { %v936_v19 = vmul.f32 %v2893_v16, %v935_v14 }
 0x381   :  { %v938_v22 = vadd.f32 %v937_v21, %v936_v19 }
 0x383   :  { %1010 = vmatmul.mubr.f32.vlgmr.msra.gmra.mrb[6].mxu0 %v938_v22  ;;  %2167 = vmatmul.mubr.f32.vlgmr.msra.gmra.mrb[14].mxu1 %v938_v22 }
 0x384   :  { %2600 = vmatpush1.bf16.msra.mxu0 %v3127_v17  ;;  %2631 = vmatpush3.bf16.msra.mxu1 %v3148_v41 }
 0x385   :  { %2602 = vmatprep.subr.bf16.mxu0 %v3130_v18  ;;  %2632 = vmatprep.subr.bf16.mxu1 %v3046_v40 }
 0x386   :  { %1178 = vmatprep.mubr.f32.mxu0 %v3045_v0  ;;  %2201 = vmatprep.mubr.msk.f32.mxu1 %vm3047_vm0, %v3045_v0 }
 0x388   :  { %2604 = vmatpush1.bf16.msra.mxu0 %v3135_v25  ;;  %2634 = vmatpush3.bf16.msra.mxu1 %v3158_v51 }
 0x389   :  { %2606 = vmatprep.subr.bf16.mxu0 %v3138_v26  ;;  %2635 = vmatprep.subr.bf16.mxu1 %v3046_v40 }
 0x38c   :  { %2608 = vmatpush1.bf16.msra.mxu0 %v3142_v34  ;;  %2637 = vmatpush3.bf16.msra.mxu1 %v3169_v61 }
 0x38d   :  { %2610 = vmatprep.subr.bf16.mxu0 %v3145_v35  ;;  %2638 = vmatprep.subr.bf16.mxu1 %v3046_v40 }
 0x390   :  { %2612 = vmatpush1.bf16.msra.mxu0 %v3152_v45  ;;  %2640 = vmatpush3.bf16.msra.mxu1 %v3180_v10 }
 0x391   :  { %2614 = vmatprep.subr.bf16.mxu0 %v3155_v46  ;;  %2641 = vmatprep.subr.bf16.mxu1 %v3046_v40 }
 0x394   :  { %2616 = vmatpush1.bf16.msra.mxu0 %v3163_v55  ;;  %2643 = vmatpush3.bf16.msra.mxu1 %v3191_v20 }
 0x395   :  { %2618 = vmatprep.subr.bf16.mxu0 %v3166_v56  ;;  %2644 = vmatprep.subr.bf16.mxu1 %v3046_v40 }
 0x398   :  { %2620 = vmatpush1.bf16.msra.mxu0 %v3174_v2  ;;  %2646 = vmatpush3.bf16.msra.mxu1 %v3202_v24 }
 0x399   :  { %2622 = vmatprep.subr.bf16.mxu0 %v3177_v4  ;;  %2647 = vmatprep.subr.bf16.mxu1 %v3046_v40 }
 0x39c   :  { %2624 = vmatpush1.bf16.msra.mxu0 %v3185_v13  ;;  %2649 = vmatpush3.bf16.msra.mxu1 %v3209_v29 }
 0x39d   :  { %2626 = vmatprep.subr.bf16.mxu0 %v3188_v15  ;;  %2650 = vmatprep.subr.bf16.mxu1 %v3046_v40 }
 0x3a0   :  { %2628 = vmatpush1.bf16.msra.mxu0 %v3198_v23  ;;  %2652 = vmatpush3.bf16.msra.mxu1 %v3217_v32 }
 0x3a1   :  { %2654 = vmatprep.subr.bf16.mxu0 %v3125_v9  ;;  %2685 = vmatprep.subr.bf16.mxu1 %v3046_v40 }
 0x456   :  { %v1011_v50 = vpop.f32.mrb[6].mxu0  ;;  %v1082_v27 = vpop.f32.mrb[14].mxu1 }
 0x457   :  { %v2827_v30 = vadd.f32 %v1011_v50, %v3272_v3  ;;  %v1013_v31 = vpop.f32.mrb[7].mxu0  ;;  %v2168_v33 = vpop.f32.mrb[15].mxu1  ;;  %v1100_v52 = vadd.f32 %v3281_v28, %v1082_v27 }
 0x458   :  { %v2828_v37 = vadd.f32 %v1013_v31, %v3274_v6 }
 0x459   :  { %v1815_v36 = vmul.f32 -1.442695, %v2827_v30 }
 0x45a   :  { %v1816_v38 = vmul.f32 -1.442695, %v2828_v37 }
 0x45b   :  { %2894 = vpow2.f32 %v1815_v36 }
 0x45c   :  { %2896 = vpow2.f32 %v1816_v38 }
 0x465   :  { %v2895_v43 = vpop.eup %2894 }
 0x466   :  { %v1090_v42 = vadd.f32 1.0, %v2895_v43  ;;  %v2897_v47 = vpop.eup %2896 }
 0x467   :  { %v1097_v49 = vadd.f32 1.0, %v2897_v47 }
 0x468   :  { %2898 = vrcp.f32 %v1090_v42 }
 0x469   :  { %2900 = vrcp.f32 %v1097_v49 }
 0x472   :  { %v2899_v54 = vpop.eup %2898 }
 0x473   :  { %v1101_v58 = vmul.f32 %v2899_v54, %v1100_v52  ;;  %v2901_v44 = vpop.eup %2900 }
 0x474   :  { %v1104_v60 = vsub.f32 1.0, %v2901_v44  ;;  %v1106_v5 = vmul.f32 %v2901_v44, %v938_v22 }
 0x475   :  { %v1102_v39 = vadd.f32 %v1101_v58, %v3260_v48 }
 0x477   :  { %2902 = vtanh.f32 %v1102_v39 }
 0x481   :  { %v2903_v63 = vpop.eup %2902 }
 0x482   :  { %v1105_v1 = vmul.f32 %v2903_v63, %v1104_v60 }
 0x484   :  { %v1107_v7 = vadd.f32 %v1106_v5, %v1105_v1 }
 0x486   :  { %1179 = vmatmul.mubr.f32.vlgmr.msra.gmra.mrb[8].mxu0 %v1107_v7  ;;  %2202 = vmatmul.mubr.f32.vlgmr.msra.gmra.mrb[16].mxu1 %v1107_v7 }
 0x487   :  { %2656 = vmatpush1.bf16.msra.mxu0 %v3127_v17  ;;  %2687 = vmatpush3.bf16.msra.mxu1 %v3148_v41 }
 0x488   :  { %2658 = vmatprep.subr.bf16.mxu0 %v3130_v18  ;;  %2688 = vmatprep.subr.bf16.mxu1 %v3046_v40 }
 0x489   :  { %1347 = vmatprep.mubr.f32.mxu0 %v3045_v0  ;;  %2236 = vmatprep.mubr.msk.f32.mxu1 %vm3047_vm0, %v3045_v0 }
 0x48b   :  { %2660 = vmatpush1.bf16.msra.mxu0 %v3135_v25  ;;  %2690 = vmatpush3.bf16.msra.mxu1 %v3158_v51 }
 0x48c   :  { %2662 = vmatprep.subr.bf16.mxu0 %v3138_v26  ;;  %2691 = vmatprep.subr.bf16.mxu1 %v3046_v40 }
 0x48f   :  { %2664 = vmatpush1.bf16.msra.mxu0 %v3142_v34  ;;  %2693 = vmatpush3.bf16.msra.mxu1 %v3169_v61 }
 0x490   :  { %2666 = vmatprep.subr.bf16.mxu0 %v3145_v35  ;;  %2694 = vmatprep.subr.bf16.mxu1 %v3046_v40 }
 0x493   :  { %2668 = vmatpush1.bf16.msra.mxu0 %v3152_v45  ;;  %2696 = vmatpush3.bf16.msra.mxu1 %v3180_v10 }
 0x494   :  { %2670 = vmatprep.subr.bf16.mxu0 %v3155_v46  ;;  %2697 = vmatprep.subr.bf16.mxu1 %v3046_v40 }
 0x497   :  { %2672 = vmatpush1.bf16.msra.mxu0 %v3163_v55  ;;  %2699 = vmatpush3.bf16.msra.mxu1 %v3191_v20 }
 0x498   :  { %2674 = vmatprep.subr.bf16.mxu0 %v3166_v56  ;;  %2700 = vmatprep.subr.bf16.mxu1 %v3046_v40 }
 0x49b   :  { %2676 = vmatpush1.bf16.msra.mxu0 %v3174_v2  ;;  %2702 = vmatpush3.bf16.msra.mxu1 %v3202_v24 }
 0x49c   :  { %2678 = vmatprep.subr.bf16.mxu0 %v3177_v4  ;;  %2703 = vmatprep.subr.bf16.mxu1 %v3046_v40 }
 0x49f   :  { %2680 = vmatpush1.bf16.msra.mxu0 %v3185_v13  ;;  %2705 = vmatpush3.bf16.msra.mxu1 %v3209_v29 }
 0x4a0   :  { %2682 = vmatprep.subr.bf16.mxu0 %v3188_v15  ;;  %2706 = vmatprep.subr.bf16.mxu1 %v3046_v40 }
 0x4a3   :  { %2684 = vmatpush1.bf16.msra.mxu0 %v3198_v23  ;;  %2708 = vmatpush3.bf16.msra.mxu1 %v3217_v32 }
 0x4a4   :  { %2710 = vmatprep.subr.bf16.mxu0 %v3125_v9  ;;  %2741 = vmatprep.subr.bf16.mxu1 %v3046_v40 }
 0x559   :  { %v1180_v48 = vpop.f32.mrb[8].mxu0  ;;  %v1251_v8 = vpop.f32.mrb[16].mxu1 }
 0x55a   :  { %v2829_v11 = vadd.f32 %v1180_v48, %v3272_v3  ;;  %v1182_v12 = vpop.f32.mrb[9].mxu0  ;;  %v2203_v14 = vpop.f32.mrb[17].mxu1  ;;  %v1269_v31 = vadd.f32 %v3281_v28, %v1251_v8 }
 0x55b   :  { %v2830_v19 = vadd.f32 %v1182_v12, %v3274_v6 }
 0x55c   :  { %v1817_v16 = vmul.f32 -1.442695, %v2829_v11 }
 0x55d   :  { %v1818_v21 = vmul.f32 -1.442695, %v2830_v19 }
 0x55e   :  { %2904 = vpow2.f32 %v1817_v16 }
 0x55f   :  { %2906 = vpow2.f32 %v1818_v21 }
 0x568   :  { %v2905_v22 = vpop.eup %2904 }
 0x569   :  { %v1259_v50 = vadd.f32 1.0, %v2905_v22  ;;  %v2907_v27 = vpop.eup %2906 }
 0x56a   :  { %v1266_v30 = vadd.f32 1.0, %v2907_v27 }
 0x56b   :  { %2908 = vrcp.f32 %v1259_v50 }
 0x56c   :  { %2910 = vrcp.f32 %v1266_v30 }
 0x575   :  { %v2909_v33 = vpop.eup %2908 }
 0x576   :  { %v1270_v36 = vmul.f32 %v2909_v33, %v1269_v31  ;;  %v2911_v38 = vpop.eup %2910 }
 0x577   :  { %v1273_v43 = vsub.f32 1.0, %v2911_v38  ;;  %v1275_v49 = vmul.f32 %v2911_v38, %v1107_v7 }
 0x578   :  { %v1271_v37 = vadd.f32 %v1270_v36, %v3266_v57 }
 0x57a   :  { %2912 = vtanh.f32 %v1271_v37 }
 0x584   :  { %v2913_v42 = vpop.eup %2912 }
 0x585   :  { %v1274_v47 = vmul.f32 %v2913_v42, %v1273_v43 }
 0x587   :  { %v1276_v52 = vadd.f32 %v1275_v49, %v1274_v47 }
 0x589   :  { %1348 = vmatmul.mubr.f32.vlgmr.msra.gmra.mrb[10].mxu0 %v1276_v52  ;;  %2237 = vmatmul.mubr.f32.vlgmr.msra.gmra.mrb[18].mxu1 %v1276_v52 }
 0x58a   :  { %2712 = vmatpush1.bf16.msra.mxu0 %v3127_v17  ;;  %2743 = vmatpush3.bf16.msra.mxu1 %v3148_v41 }
 0x58b   :  { %2714 = vmatprep.subr.bf16.mxu0 %v3130_v18  ;;  %2744 = vmatprep.subr.bf16.mxu1 %v3046_v40 }
 0x58c   :  { %1516 = vmatprep.mubr.f32.mxu0 %v3045_v0  ;;  %2271 = vmatprep.mubr.msk.f32.mxu1 %vm3047_vm0, %v3045_v0 }
 0x58e   :  { %2716 = vmatpush1.bf16.msra.mxu0 %v3135_v25  ;;  %2746 = vmatpush3.bf16.msra.mxu1 %v3158_v51 }
 0x58f   :  { %2718 = vmatprep.subr.bf16.mxu0 %v3138_v26  ;;  %2747 = vmatprep.subr.bf16.mxu1 %v3046_v40 }
 0x592   :  { %2720 = vmatpush1.bf16.msra.mxu0 %v3142_v34  ;;  %2749 = vmatpush3.bf16.msra.mxu1 %v3169_v61 }
 0x593   :  { %2722 = vmatprep.subr.bf16.mxu0 %v3145_v35  ;;  %2750 = vmatprep.subr.bf16.mxu1 %v3046_v40 }
 0x596   :  { %2724 = vmatpush1.bf16.msra.mxu0 %v3152_v45  ;;  %2752 = vmatpush3.bf16.msra.mxu1 %v3180_v10 }
 0x597   :  { %2726 = vmatprep.subr.bf16.mxu0 %v3155_v46  ;;  %2753 = vmatprep.subr.bf16.mxu1 %v3046_v40 }
 0x59a   :  { %2728 = vmatpush1.bf16.msra.mxu0 %v3163_v55  ;;  %2755 = vmatpush3.bf16.msra.mxu1 %v3191_v20 }
 0x59b   :  { %2730 = vmatprep.subr.bf16.mxu0 %v3166_v56  ;;  %2756 = vmatprep.subr.bf16.mxu1 %v3046_v40 }
 0x59e   :  { %2732 = vmatpush1.bf16.msra.mxu0 %v3174_v2  ;;  %2758 = vmatpush3.bf16.msra.mxu1 %v3202_v24 }
 0x59f   :  { %2734 = vmatprep.subr.bf16.mxu0 %v3177_v4  ;;  %2759 = vmatprep.subr.bf16.mxu1 %v3046_v40 }
 0x5a2   :  { %2736 = vmatpush1.bf16.msra.mxu0 %v3185_v13  ;;  %2761 = vmatpush3.bf16.msra.mxu1 %v3209_v29 }
 0x5a3   :  { %2738 = vmatprep.subr.bf16.mxu0 %v3188_v15  ;;  %2762 = vmatprep.subr.bf16.mxu1 %v3046_v40 }
 0x5a6   :  { %2740 = vmatpush1.bf16.msra.mxu0 %v3198_v23  ;;  %2764 = vmatpush3.bf16.msra.mxu1 %v3217_v32 }
 0x5a7   :  { %2766 = vmatprep.subr.bf16.mxu0 %v3125_v9  ;;  %2797 = vmatprep.subr.bf16.mxu1 %v3046_v40 }
 0x65c   :  { %v1349_v57 = vpop.f32.mrb[10].mxu0  ;;  %v1420_v54 = vpop.f32.mrb[18].mxu1 }
 0x65d   :  { %v2831_v58 = vadd.f32 %v1349_v57, %v3272_v3  ;;  %v1351_v39 = vpop.f32.mrb[11].mxu0  ;;  %v2238_v44 = vpop.f32.mrb[19].mxu1  ;;  %v1438_v9 = vadd.f32 %v3281_v28, %v1420_v54 }
 0x65e   :  { %v2832_v63 = vadd.f32 %v1351_v39, %v3274_v6 }
 0x65f   :  { %v1819_v60 = vmul.f32 -1.442695, %v2831_v58 }
 0x660   :  { %v1820_v1 = vmul.f32 -1.442695, %v2832_v63 }
 0x661   :  { %2914 = vpow2.f32 %v1819_v60 }
 0x662   :  { %2916 = vpow2.f32 %v1820_v1 }
 0x66b   :  { %v2915_v5 = vpop.eup %2914 }
 0x66c   :  { %v1428_v7 = vadd.f32 1.0, %v2915_v5  ;;  %v2917_v48 = vpop.eup %2916 }
 0x66d   :  { %v1435_v8 = vadd.f32 1.0, %v2917_v48 }
 0x66e   :  { %2918 = vrcp.f32 %v1428_v7 }
 0x66f   :  { %2920 = vrcp.f32 %v1435_v8 }
 0x678   :  { %v2919_v11 = vpop.eup %2918 }
 0x679   :  { %v1439_v12 = vmul.f32 %v2919_v11, %v1438_v9  ;;  %v2921_v16 = vpop.eup %2920 }
 0x67a   :  { %v1442_v19 = vsub.f32 1.0, %v2921_v16  ;;  %v1444_v50 = vmul.f32 %v2921_v16, %v1276_v52 }
 0x67b   :  { %v1440_v14 = vadd.f32 %v1439_v12, %v3264_v53 }
 0x67d   :  { %2922 = vtanh.f32 %v1440_v14 }
 0x687   :  { %v2923_v21 = vpop.eup %2922 }
 0x688   :  { %v1443_v22 = vmul.f32 %v2923_v21, %v1442_v19 }
 0x68a   :  { %v1445_v27 = vadd.f32 %v1444_v50, %v1443_v22 }
 0x68c   :  { %1517 = vmatmul.mubr.f32.vlgmr.msra.gmra.mrb[12].mxu0 %v1445_v27  ;;  %2272 = vmatmul.mubr.f32.vlgmr.msra.gmra.mrb[20].mxu1 %v1445_v27 }
 0x68d   :  { %2768 = vmatpush1.bf16.msra.mxu0 %v3127_v17  ;;  %2799 = vmatpush3.bf16.msra.mxu1 %v3148_v41 }
 0x68e   :  { %2770 = vmatprep.subr.bf16.mxu0 %v3130_v18  ;;  %2800 = vmatprep.subr.bf16.mxu1 %v3046_v40 }
 0x68f   :  { %1685 = vmatprep.mubr.f32.mxu0 %v3045_v0  ;;  %2306 = vmatprep.mubr.msk.f32.mxu1 %vm3047_vm0, %v3045_v0 }
 0x691   :  { %2772 = vmatpush1.bf16.msra.mxu0 %v3135_v25  ;;  %2802 = vmatpush3.bf16.msra.mxu1 %v3158_v51 }
 0x692   :  { %2774 = vmatprep.subr.bf16.mxu0 %v3138_v26  ;;  %2803 = vmatprep.subr.bf16.mxu1 %v3046_v40 }
 0x695   :  { %2776 = vmatpush1.bf16.msra.mxu0 %v3142_v34  ;;  %2805 = vmatpush3.bf16.msra.mxu1 %v3169_v61 }
 0x696   :  { %2778 = vmatprep.subr.bf16.mxu0 %v3145_v35  ;;  %2806 = vmatprep.subr.bf16.mxu1 %v3046_v40 }
 0x699   :  { %2780 = vmatpush1.bf16.msra.mxu0 %v3152_v45  ;;  %2808 = vmatpush3.bf16.msra.mxu1 %v3180_v10 }
 0x69a   :  { %2782 = vmatprep.subr.bf16.mxu0 %v3155_v46  ;;  %2809 = vmatprep.subr.bf16.mxu1 %v3046_v40 }
 0x69d   :  { %2784 = vmatpush1.bf16.msra.mxu0 %v3163_v55  ;;  %2811 = vmatpush3.bf16.msra.mxu1 %v3191_v20 }
 0x69e   :  { %2786 = vmatprep.subr.bf16.mxu0 %v3166_v56  ;;  %2812 = vmatprep.subr.bf16.mxu1 %v3046_v40 }
 0x6a1   :  { %2788 = vmatpush1.bf16.msra.mxu0 %v3174_v2  ;;  %2814 = vmatpush3.bf16.msra.mxu1 %v3202_v24 }
 0x6a2   :  { %2790 = vmatprep.subr.bf16.mxu0 %v3177_v4  ;;  %2815 = vmatprep.subr.bf16.mxu1 %v3046_v40 }
 0x6a5   :  { %2792 = vmatpush1.bf16.msra.mxu0 %v3185_v13  ;;  %2817 = vmatpush3.bf16.msra.mxu1 %v3209_v29 }
 0x6a6   :  { %2794 = vmatprep.subr.bf16.mxu0 %v3188_v15  ;;  %2818 = vmatprep.subr.bf16.mxu1 %v3046_v40 }
 0x6a9   :  { %2796 = vmatpush1.bf16.msra.mxu0 %v3198_v23  ;;  %2820 = vmatpush3.bf16.msra.mxu1 %v3217_v32 }
 0x75f   :  { %v1518_v0 = vpop.f32.mrb[12].mxu0  ;;  %v1589_v17 = vpop.f32.mrb[20].mxu1 }
 0x760   :  { %v2833_v18 = vadd.f32 %v1518_v0, %v3272_v3  ;;  %v1520_v25 = vpop.f32.mrb[13].mxu0  ;;  %v2273_v26 = vpop.f32.mrb[21].mxu1  ;;  %v1607_v55 = vadd.f32 %v3281_v28, %v1589_v17 }
 0x761   :  { %v2834_v35 = vadd.f32 %v1520_v25, %v3274_v6 }
 0x762   :  { %v1821_v34 = vmul.f32 -1.442695, %v2833_v18 }
 0x763   :  { %v1822_v41 = vmul.f32 -1.442695, %v2834_v35 }
 0x764   :  { %2924 = vpow2.f32 %v1821_v34 }
 0x765   :  { %2926 = vpow2.f32 %v1822_v41 }
 0x76e   :  { %v2925_v45 = vpop.eup %2924 }
 0x76f   :  { %v1597_v46 = vadd.f32 1.0, %v2925_v45  ;;  %v2927_v40 = vpop.eup %2926 }
 0x770   :  { %v1604_v51 = vadd.f32 1.0, %v2927_v40 }
 0x771   :  { %2928 = vrcp.f32 %v1597_v46 }
 0x772   :  { %2930 = vrcp.f32 %v1604_v51 }
 0x77b   :  { %v2929_v56 = vpop.eup %2928 }
 0x77c   :  { %v1608_v61 = vmul.f32 %v2929_v56, %v1607_v55  ;;  %v2931_v4 = vpop.eup %2930 }
 0x77d   :  { %v1611_v10 = vsub.f32 1.0, %v2931_v4  ;;  %v1613_v20 = vmul.f32 %v2931_v4, %v1445_v27 }
 0x77e   :  { %v1609_v2 = vadd.f32 %v1608_v61, %v3270_v62 }
 0x780   :  { %2932 = vtanh.f32 %v1609_v2 }
 0x78a   :  { %v2933_v13 = vpop.eup %2932 }
 0x78b   :  { %v1612_v15 = vmul.f32 %v2933_v13, %v1611_v10 }
 0x78d   :  { %v1614_v23 = vadd.f32 %v1613_v20, %v1612_v15 }
 0x78f   :  { %1686 = vmatmul.mubr.f32.vlgmr.msra.gmra.mrb[14].mxu0 %v1614_v23  ;;  %2307 = vmatmul.mubr.f32.vlgmr.msra.gmra.mrb[22].mxu1 %v1614_v23 }
 0x862   :  { %v1687_v24 = vpop.f32.mrb[14].mxu0  ;;  %v1758_v29 = vpop.f32.mrb[22].mxu1 }
 0x863   :  { %v2835_v32 = vadd.f32 %v1687_v24, %v3272_v3  ;;  %v1689_v53 = vpop.f32.mrb[15].mxu0  ;;  %v2308_v30 = vpop.f32.mrb[23].mxu1  ;;  %v1776_v42 = vadd.f32 %v3281_v28, %v1758_v29 }
 0x864   :  { %v2836_v33 = vadd.f32 %v1689_v53, %v3274_v6 }
 0x865   :  { %v1823_v31 = vmul.f32 -1.442695, %v2835_v32 }
 0x866   :  { %v1824_v62 = vmul.f32 -1.442695, %v2836_v33 }
 0x867   :  { %2934 = vpow2.f32 %v1823_v31 }
 0x868   :  { %2936 = vpow2.f32 %v1824_v62 }
 0x871   :  { %v2935_v36 = vpop.eup %2934 }
 0x872   :  { %v1766_v37 = vadd.f32 1.0, %v2935_v36  ;;  %v2937_v38 = vpop.eup %2936 }
 0x873   :  { %v1773_v43 = vadd.f32 1.0, %v2937_v38 }
 0x874   :  { %2938 = vrcp.f32 %v1766_v37 }
 0x875   :  { %2940 = vrcp.f32 %v1773_v43 }
 0x87e   :  { %v2939_v47 = vpop.eup %2938 }
 0x87f   :  { %v1777_v49 = vmul.f32 %v2939_v47, %v1776_v42  ;;  %v2941_v52 = vpop.eup %2940 }
 0x880   :  { %v1780_v57 = vsub.f32 1.0, %v2941_v52  ;;  %v1782_v58 = vmul.f32 %v2941_v52, %v1614_v23 }
 0x881   :  { %v1778_v3 = vadd.f32 %v1777_v49, %v3268_v59 }
 0x883   :  { %2942 = vtanh.f32 %v1778_v3 }
 0x88d   :  { %v2943_v54 = vpop.eup %2942 }
 0x88e   :  { %v1781_v6 = vmul.f32 %v2943_v54, %v1780_v57 }
 0x890   :  { %v1783_v39 = vadd.f32 %v1782_v58, %v1781_v6 }
 0x892   :  { %1784 = vst [vmem:[#allocation9] sm:$0xff] %v1783_v39 }
 0x893   :  { %3021 = shalt.err (!%p3018_p0)
}
 0x894   :  { %s3022_s12 = scalar_lea.hbm %s3537_s5, 128 }
 0x895   :  { %p3023_p1 = scmp.ne.s32.totalorder %s3537_s5, %s3022_s12  ;;  %p3026_p2 = scmp.lt.u32.totalorder %s3022_s12, %s3537_s5 }
 0x897   :  { %p3028_p3 = pnand %p3026_p2, %p3023_p1 }
 0x899   :  { %3031 = shalt.err (!%p3028_p3)
}
 0x89a   :  { %1794 = dma.vmem_to_hbm [thread:$0]  %s1792_s8, 128, %s3537_s5, [#allocation5]  }
 0x89b   :  { %3036 = dma.done.wait [#allocation5], 128  }
 0x89c   :  { %3037 = vsyncadd [#allocation5], 4294967168 }
 0x89d   :  { %1798 = vsyncpa [#allocation4], 1 }
 0x89e   :  { %1799 = vsyncpa [#allocation7], 1 }
 0x89f   :  { %1800 = vsyncpa [#allocation5], 1 }

</bundles_post_ra>
